<compile_context>
chip_gen: v7x
topology: tpu7x:2x2x1
jax: 0.10.0
libtpu: 0.0.40
codegen_flags: <defaults>
</compile_context>

<pallas_src>
import jax
import jax.numpy as jnp
from jax.experimental import pallas as pl
from jax.experimental.pallas import tpu as pltpu

BN_EPS = 1e-5


def _round_up(x, m):
    return ((x + m - 1) // m) * m


# ----------------------------------------------------------------------------
# Kernels
# ----------------------------------------------------------------------------
def _neck_kernel(x_ref, w_ref, b_ref, out_ref):
    # x_ref:   (tn, CHW)  -- one batch tile of the flattened input (pipelined)
    # w_ref:   (CHW, Kp)  -- folded (dw * bn * fc) weight, resident
    # b_ref:   (1, Kp)    -- folded bias (f32)
    # out_ref: (tn, Kp)
    acc = jnp.dot(x_ref[...], w_ref[...], preferred_element_type=jnp.float32)
    out_ref[...] = (acc + b_ref[...]).astype(out_ref.dtype)


def _neck_kernel_ktiled(x_ref, w_ref, b_ref, out_ref, acc_ref):
    # Contraction-tiled variant: grid = (batch_tiles, CHW_tiles), k innermost.
    k = pl.program_id(1)

    @pl.when(k == 0)
    def _():
        acc_ref[...] = jnp.zeros_like(acc_ref)

    acc_ref[...] += jnp.dot(x_ref[...], w_ref[...],
                            preferred_element_type=jnp.float32)

    @pl.when(k == pl.num_programs(1) - 1)
    def _():
        out_ref[...] = (acc_ref[...] + b_ref[...]).astype(out_ref.dtype)


# ----------------------------------------------------------------------------
# Parameter folding (done once, in f32; weight cast only at the very end)
# ----------------------------------------------------------------------------
def _fold_params(params, C, HW, K, weight_dtype):
    s = params["bn_gamma"].astype(jnp.float32) * jax.lax.rsqrt(
        params["bn_var"].astype(jnp.float32) + BN_EPS)                    # (C,)
    t = params["bn_beta"].astype(jnp.float32) - params["bn_mean"].astype(jnp.float32) * s
    wdw = params["dw_weight"].reshape(C, HW).astype(jnp.float32)          # (C, HW)
    wfc = params["fc_weight"].astype(jnp.float32)                         # (K, C)

    w_fold = (wdw * s[:, None])[:, :, None] * wfc.T[:, None, :]           # (C, HW, K)
    w_fold = w_fold.reshape(C * HW, K)
    b_fold = (params["dw_bias"].astype(jnp.float32) * s + t) @ wfc.T \
        + params["fc_bias"].astype(jnp.float32)                           # (K,)
    return w_fold.astype(weight_dtype), b_fold.astype(jnp.float32)


# ----------------------------------------------------------------------------
# VMEM / tile sizing (generation aware)
# ----------------------------------------------------------------------------
def _vmem_capacity_bytes():
    default = 64 * 1024 * 1024  # safe on every generation
    try:
        info_fn = getattr(pltpu, "get_tpu_info", None)
        if info_fn is None:
            return default
        cap = getattr(info_fn(), "vmem_capacity_bytes", None)
        return int(cap) if cap else default
    except Exception:
        return default


def _vmem_budget():
    cap = _vmem_capacity_bytes()
    # ~96 MiB limit on 128 MiB parts (v5e/v6e), ~48 MiB on 64 MiB parts (v7x).
    vmem_limit = min(int(cap * 0.75), cap - 8 * 1024 * 1024)
    vmem_limit = max(vmem_limit, 32 * 1024 * 1024)
    budget = vmem_limit - 2 * 1024 * 1024
    tn_cap = 2048 if cap >= 96 * 1024 * 1024 else 1024
    return budget, vmem_limit, tn_cap


def _choose_tn(vmem_left, row_bytes, N, tn_cap):
    tn = max(8, vmem_left // row_bytes)
    tn = int(min(tn_cap, (tn // 8) * 8))
    if tn >= 128:
        tn = (tn // 128) * 128      # MXU-friendly full sublane tiles (v5e note)
    # Keep >=2 (>=4 for large N) grid steps so a multi-core part (v7x) can
    # shard the "parallel" batch axis across both TensorCores.
    if N >= 64:
        tn = min(tn, _round_up(-(-N // 4), 8))
    elif N >= 16:
        tn = min(tn, _round_up(-(-N // 2), 8))
    return max(1, min(tn, N))       # full-extent (tn == N) block is legal


# ----------------------------------------------------------------------------
# Public wrapper
# ----------------------------------------------------------------------------
def global_dw_neck(x_nchw, params, streaming_dtype=None, force_k_tiling=False):
    """x_nchw: (N, C, H, W) with (H, W) == depthwise kernel size."""
    N, C, H, W = x_nchw.shape
    HW = H * W
    CHW = C * HW
    assert params["dw_weight"].shape == (C, 1, H, W), \
        "spatial dims must equal kernel_size (conv output must be 1x1)"
    K = params["fc_weight"].shape[0]

    # Streaming dtype: default is the input's own dtype.  Pass a bf16 x (or set
    # streaming_dtype=jnp.bfloat16 when the producer already emits bf16) to
    # halve the dominant HBM read.  Folding is always done in f32.
    stream_dtype = jnp.dtype(x_nchw.dtype) if streaming_dtype is None else jnp.dtype(streaming_dtype)
    out_dtype = x_nchw.dtype

    w_fold, b_fold = _fold_params(params, C, HW, K, stream_dtype)

    # Lane-dense output: pad K up to a multiple of 128 (wrapper slices back).
    Kp = max(128, _round_up(K, 128))
    if Kp != K:
        w_fold = jnp.pad(w_fold, ((0, 0), (0, Kp - K)))
        b_fold = jnp.pad(b_fold, ((0, Kp - K),))
    b_fold = b_fold.reshape(1, Kp)

    # Free contiguous reshape of NCHW; NO batch padding copy in HBM.
    x_flat = x_nchw.reshape(N, CHW)
    if x_flat.dtype != stream_dtype:
        # Only worthwhile if the upstream producer can emit this dtype; a
        # standalone cast of an f32 x would add an extra HBM round trip.
        x_flat = x_flat.astype(stream_dtype)

    x_item = jnp.dtype(stream_dtype).itemsize
    w_item = jnp.dtype(w_fold.dtype).itemsize
    out_item = jnp.dtype(out_dtype).itemsize

    budget, vmem_limit, tn_cap = _vmem_budget()

    # Real VMEM footprint: every BlockSpec is double-buffered by default, so
    # the resident weight costs 2*w_bytes and in/out tiles cost 2x each.
    w_bytes = CHW * Kp * w_item + Kp * 4
    row_bytes_full = 2 * CHW * x_item + 2 * Kp * out_item
    tn_fit = (budget - 2 * w_bytes) // row_bytes_full if budget > 2 * w_bytes else 0
    use_k_tiling = force_k_tiling or (tn_fit < min(N, 64))

    compiler_params_1d = pltpu.CompilerParams(
        dimension_semantics=("parallel",), vmem_limit_bytes=vmem_limit)
    compiler_params_2d = pltpu.CompilerParams(
        dimension_semantics=("parallel", "arbitrary"), vmem_limit_bytes=vmem_limit)

    if not use_k_tiling:
        # ---- Path A: weight fully resident, stream batch tiles -------------
        tn = _choose_tn(budget - 2 * w_bytes, row_bytes_full, N, tn_cap)
        grid = (pl.cdiv(N, tn),)
        cost = pl.CostEstimate(
            flops=2 * N * CHW * Kp,
            transcendentals=0,
            bytes_accessed=N * CHW * x_item + w_bytes + N * Kp * out_item)

        out = pl.pallas_call(
            _neck_kernel,
            out_shape=jax.ShapeDtypeStruct((N, Kp), out_dtype),
            grid_spec=pltpu.PrefetchScalarGridSpec(
                num_scalar_prefetch=0,
                grid=grid,
                in_specs=[
                    pl.BlockSpec((tn, CHW), lambda i: (i, 0)),   # x (pipelined)
                    pl.BlockSpec((CHW, Kp), lambda i: (0, 0)),   # folded weight
                    pl.BlockSpec((1, Kp), lambda i: (0, 0)),     # folded bias
                ],
                out_specs=pl.BlockSpec((tn, Kp), lambda i: (i, 0)),
            ),
            compiler_params=compiler_params_1d,
            cost_estimate=cost,
        )(x_flat, w_fold, b_fold)
        return out[:, :K]

    # ---- Path B: contraction-tiled fallback (large C*HW / small VMEM) ------
    CHWp = CHW
    if CHW % 128 != 0:
        # Rare corner: need a lane-aligned contraction tile.  Weight pad is
        # cheap; the x pad is a one-time copy accepted only on this path.
        # TODO(synk): avoid the x copy by masking the ragged final k-tile.
        CHWp = _round_up(CHW, 128)
        w_fold = jnp.pad(w_fold, ((0, CHWp - CHW), (0, 0)))
        x_flat = jnp.pad(x_flat, ((0, 0), (0, CHWp - CHW)))

    # Largest multiple-of-128 divisor of CHWp, capped.
    tk = 128
    for cand in range(min(CHWp, 4096) // 128, 0, -1):
        if CHWp % (cand * 128) == 0:
            tk = cand * 128
            break

    w_tile_bytes = 2 * (tk * Kp * w_item) + 2 * Kp * 4
    row_bytes_k = 2 * tk * x_item + 2 * Kp * out_item + Kp * 4  # + acc scratch
    tn = _choose_tn(max(0, budget - w_tile_bytes), row_bytes_k, N, tn_cap)

    grid = (pl.cdiv(N, tn), CHWp // tk)
    cost = pl.CostEstimate(
        flops=2 * N * CHWp * Kp,
        transcendentals=0,
        bytes_accessed=N * CHWp * x_item + CHWp * Kp * w_item + N * Kp * out_item)

    out = pl.pallas_call(
        _neck_kernel_ktiled,
        out_shape=jax.ShapeDtypeStruct((N, Kp), out_dtype),
        grid_spec=pltpu.PrefetchScalarGridSpec(
            num_scalar_prefetch=0,
            grid=grid,
            in_specs=[
                pl.BlockSpec((tn, tk), lambda i, k: (i, k)),     # x tile
                pl.BlockSpec((tk, Kp), lambda i, k: (k, 0)),     # weight k-tile
                pl.BlockSpec((1, Kp), lambda i, k: (0, 0)),      # bias
            ],
            out_specs=pl.BlockSpec((tn, Kp), lambda i, k: (i, 0)),
            scratch_shapes=[pltpu.VMEM((tn, Kp), jnp.float32)],  # f32 accumulator
        ),
        compiler_params=compiler_params_2d,
        cost_estimate=cost,
    )(x_flat, w_fold, b_fold)
    return out[:, :K]


# ----------------------------------------------------------------------------
# Pure-JAX reference (unfolded) and parameter init
# ----------------------------------------------------------------------------
def _reference(x_nchw, params):
    N, C, H, W = x_nchw.shape
    wdw = params["dw_weight"].reshape(C, H * W)
    y = jnp.sum(x_nchw.reshape(N, C, H * W).astype(jnp.float32) * wdw[None], axis=-1)
    y = y + params["dw_bias"][None, :]
    z = (y - params["bn_mean"]) * jax.lax.rsqrt(params["bn_var"] + BN_EPS)
    z = z * params["bn_gamma"] + params["bn_beta"]
    return z @ params["fc_weight"].T + params["fc_bias"]


def init_params(key, in_channels, out_channels, kernel_size):
    kh, kw = kernel_size
    ks = jax.random.split(key, 8)
    return {
        "dw_weight": 0.1 * jax.random.normal(ks[0], (in_channels, 1, kh, kw), jnp.float32),
        "dw_bias": 0.1 * jax.random.normal(ks[1], (in_channels,), jnp.float32),
        "bn_gamma": 1.0 + 0.05 * jax.random.normal(ks[2], (in_channels,), jnp.float32),
        "bn_beta": 0.05 * jax.random.normal(ks[3], (in_channels,), jnp.float32),
        "bn_mean": 0.1 * jax.random.normal(ks[4], (in_channels,), jnp.float32),
        "bn_var": 0.5 + jnp.abs(jax.random.normal(ks[5], (in_channels,), jnp.float32)),
        "fc_weight": 0.05 * jax.random.normal(ks[6], (out_channels, in_channels), jnp.float32),
        "fc_bias": 0.05 * jax.random.normal(ks[7], (out_channels,), jnp.float32),
    }


if __name__ == "__main__":
    key = jax.random.PRNGKey(0)
    k1, k2, k3, k4, k5, k6 = jax.random.split(key, 6)

    # --- test 1: f32 streaming, strict parity, kernel_size=(7,6) ------------
    N, C, K = 2, 128, 32
    H, W = 7, 6
    x = jax.random.normal(k1, (N, C, H, W), jnp.float32)
    params = init_params(k2, in_channels=C, out_channels=K, kernel_size=(H, W))
    out = jax.block_until_ready(global_dw_neck(x, params))
    ref = _reference(x, params)
    assert out.shape == (N, K)
    assert jnp.allclose(out, ref, atol=1e-3, rtol=1e-3), \
        f"f32 max err {jnp.max(jnp.abs(out - ref))}"

    # --- test 2: bf16 streaming (halves x HBM read), partial batch tile -----
    N2, C2 = 18, 64
    x2 = jax.random.normal(k3, (N2, C2, H, W), jnp.float32).astype(jnp.bfloat16)
    params2 = init_params(k4, in_channels=C2, out_channels=K, kernel_size=(H, W))
    out2 = jax.block_until_ready(global_dw_neck(x2, params2))
    ref2 = _reference(x2.astype(jnp.float32), params2)
    assert out2.shape == (N2, K)
    err2 = float(jnp.max(jnp.abs(out2.astype(jnp.float32) - ref2)))
    assert err2 < 5e-2, f"bf16 max err {err2}"

    # --- test 3: force the contraction-tiled (large C*HW) fallback ----------
    N3, C3, H3, W3 = 8, 128, 8, 8
    x3 = jax.random.normal(k5, (N3, C3, H3, W3), jnp.float32)
    params3 = init_params(k6, in_channels=C3, out_channels=K, kernel_size=(H3, W3))
    out3 = jax.block_until_ready(global_dw_neck(x3, params3, force_k_tiling=True))
    ref3 = _reference(x3, params3)
    assert out3.shape == (N3, K)
    assert jnp.allclose(out3, ref3, atol=1e-3, rtol=1e-3), \
        f"ktiled max err {jnp.max(jnp.abs(out3 - ref3))}"

    print("KERNEL_OK")
</pallas_src>

<mosaic_0001>
module attributes {stable_mosaic.version = 11 : i64} {
  func.func @_neck_kernel(%arg0: i32, %arg1: memref<2x5376xf32, #tpu.memory_space<vmem>>, %arg2: memref<5376x128xf32, #tpu.memory_space<vmem>>, %arg3: memref<1x128xf32, #tpu.memory_space<vmem>>, %arg4: memref<2x128xf32, #tpu.memory_space<vmem>>) attributes {dimension_semantics = [#tpu.dimension_semantics<parallel>], iteration_bounds = array<i64: 1>, scalar_prefetch = 0 : i64, scratch_operands = 0 : i64, tpu.core_type = #tpu.core_type<tc>, window_params = [{transform_indices = @transform_0, window_bounds = array<i64: 2, 5376>}, {pipeline_mode = #tpu.pipeline_mode<synchronous>, transform_indices = @transform_1, window_bounds = array<i64: 5376, 128>}, {pipeline_mode = #tpu.pipeline_mode<synchronous>, transform_indices = @transform_2, window_bounds = array<i64: 1, 128>}, {transform_indices = @transform_3, window_bounds = array<i64: 2, 128>}]} {
    %c0 = arith.constant 0 : index
    %c0_0 = arith.constant 0 : index
    %0 = vector.load %arg1[%c0, %c0_0] : memref<2x5376xf32, #tpu.memory_space<vmem>>, vector<2x5376xf32>
    %c0_1 = arith.constant 0 : index
    %c0_2 = arith.constant 0 : index
    %1 = vector.load %arg2[%c0_1, %c0_2] : memref<5376x128xf32, #tpu.memory_space<vmem>>, vector<5376x128xf32>
    %cst = arith.constant dense<0.000000e+00> : vector<2x128xf32>
    %2 = tpu.matmul %0, %1, %cst {dimension_numbers = #tpu.dot_dimension_numbers<[1], [0], [0], [1], [0, 0, 1, 1], [], []>} : vector<2x5376xf32>, vector<5376x128xf32>, vector<2x128xf32> -> vector<2x128xf32>
    %c0_3 = arith.constant 0 : index
    %c0_4 = arith.constant 0 : index
    %3 = vector.load %arg3[%c0_3, %c0_4] : memref<1x128xf32, #tpu.memory_space<vmem>>, vector<1x128xf32>
    %4 = vector.broadcast %3 : vector<1x128xf32> to vector<2x128xf32>
    %5 = arith.addf %2, %4 : vector<2x128xf32>
    %c0_5 = arith.constant 0 : index
    %c0_6 = arith.constant 0 : index
    %6 = vector.load %arg4[%c0_5, %c0_6] : memref<2x128xf32, #tpu.memory_space<vmem>>, vector<2x128xf32>
    tpu.vector_store %arg4[%c0_5, %c0_6], %5 {strides = array<i32>} : memref<2x128xf32, #tpu.memory_space<vmem>>, vector<2x128xf32>,
    return
  }
  func.func @transform_0(%arg0: i32) -> (i32, i32) {
    %c0_i32 = arith.constant 0 : i32
    %c0_i32_0 = arith.constant 0 : i32
    return %arg0, %c0_i32 : i32, i32
  }
  func.func @transform_1(%arg0: i32) -> (i32, i32) {
    %c0_i32 = arith.constant 0 : i32
    %c0_i32_0 = arith.constant 0 : i32
    %c0_i32_1 = arith.constant 0 : i32
    return %c0_i32, %c0_i32_0 : i32, i32
  }
  func.func @transform_2(%arg0: i32) -> (i32, i32) {
    %c0_i32 = arith.constant 0 : i32
    %c0_i32_0 = arith.constant 0 : i32
    %c0_i32_1 = arith.constant 0 : i32
    return %c0_i32, %c0_i32_0 : i32, i32
  }
  func.func @transform_3(%arg0: i32) -> (i32, i32) {
    %c0_i32 = arith.constant 0 : i32
    %c0_i32_0 = arith.constant 0 : i32
    return %arg0, %c0_i32 : i32, i32
  }
}

</mosaic_0001>

<bundles_post_ra>
// kernel: tpu_custom_call.1
= control target key start
LH: loop header
LB: loop body
LE: loop exit
PB: predicated region body
PF: predicated region fallthrough
CT: control target
= control target key end

     0   :  { %8 = vsyncpa [#allocation3], 0  ;;  %s4181_s0 = inlined_call_operand.hbm [shape: f32[2,5376], index: 0, kind: input, shape index: {}]   ;;  %s4182_s1 = inlined_call_operand.hbm [shape: f32[5376,128], index: 1, kind: input, shape index: {}]   ;;  %s4183_s2 = inlined_call_operand.hbm [shape: f32[1,128], index: 2, kind: input, shape index: {}]   ;;  %s4184_s3 = inlined_call_operand.hbm [shape: f32[2,128], index: 3, kind: output, shape index: {}]  }
   0x1   :  { %9 = vsyncpa [#allocation6], 0 }
   0x2   :  { %10 = vsyncpa [#allocation4], 0  ;;  %s3980_s12 = smov [#allocation5]   ;;  %s3886_s16 = scalar_lea.hbm %s4182_s1, 86016 }
   0x3   :  { %s26_s13 = sshll.u32 %s3980_s12, 4  ;;  %p3887_p0 = scmp.ne.s32.totalorder %s4182_s1, %s3886_s16  ;;  %s27_s13 = int_to_ptr.vmem [resolvable:$true] %s26_s13 }
   0x4   :  { %p3890_p1 = scmp.lt.u32.totalorder %s3886_s16, %s4182_s1 }
   0x6   :  { %p3892_p2 = pnand %p3890_p1, %p3887_p0 }
   0x8   :  { %3895 = shalt.err (!%p3892_p2)
}
   0x9   :  { %s3896_s21 = scalar_lea.vmem %s27_s13, 86016  ;;  %p3901_p4 = scmp.lt.s32.totalorder %s27_s13, %s27_s13 }
   0xa   :  { %p3897_p3 = scmp.ne.s32.totalorder %s27_s13, %s3896_s21  ;;  %p3902_p5 = scmp.lt.s32.totalorder %s3896_s21, %s3896_s21 }
   0xc   :  { %p3903_p6 = por %p3902_p5, %p3901_p4 }
   0xe   :  { %p3904_p7 = pnand %p3903_p6, %p3897_p3 }
  0x10   :  { %3907 = shalt.err (!%p3904_p7)
}
  0x11   :  { %s3981_s22 = smov 128   ;;  %s3982_s23 = smov 8  }
  0x12   :  { %32 = dma.hbm_to_vmem [thread:$0]  %s4182_s1, 86016, %s27_s13, [#allocation6], %s3981_s22, %s3981_s22, %s3982_s23  }
  0x13   :  { %s3983_s26 = smov [#allocation2]   ;;  %s3984_s28 = smov [#allocation7]  }
  0x14   :  { %s17_s27 = sshll.u32 %s3983_s26, 4  ;;  %s39_s29 = sshll.u32 %s3984_s28, 4  ;;  %s18_s27 = int_to_ptr.vmem [resolvable:$true] %s17_s27  ;;  %s40_s29 = int_to_ptr.vmem [resolvable:$true] %s39_s29 }
  0x15   :  { %s3908_s5 = scalar_lea.hbm %s4181_s0, 1344 }
  0x16   :  { %p3909_p8 = scmp.ne.s32.totalorder %s4181_s0, %s3908_s5  ;;  %p3912_p9 = scmp.lt.u32.totalorder %s3908_s5, %s4181_s0 }
  0x18   :  { %p3914_p10 = pnand %p3912_p9, %p3909_p8 }
  0x1a   :  { %3917 = shalt.err (!%p3914_p10)
}
  0x1b   :  { %s3918_s1 = scalar_lea.vmem %s18_s27, 1344  ;;  %p3923_p12 = scmp.lt.s32.totalorder %s18_s27, %s18_s27 }
  0x1c   :  { %p3919_p11 = scmp.ne.s32.totalorder %s18_s27, %s3918_s1  ;;  %p3924_p13 = scmp.lt.s32.totalorder %s3918_s1, %s3918_s1 }
  0x1e   :  { %p3925_p0 = por %p3924_p13, %p3923_p12 }
  0x20   :  { %p3926_p1 = pnand %p3925_p0, %p3919_p11 }
  0x22   :  { %3929 = shalt.err (!%p3926_p1)
}
  0x23   :  { %20 = dma.hbm_to_vmem [thread:$0]  %s4181_s0, 1344, %s18_s27, [#allocation3]  }
  0x24   :  { %s3930_s14 = scalar_lea.hbm %s4183_s2, 16 }
  0x25   :  { %p3931_p2 = scmp.ne.s32.totalorder %s4183_s2, %s3930_s14  ;;  %p3934_p3 = scmp.lt.u32.totalorder %s3930_s14, %s4183_s2 }
  0x27   :  { %p3936_p4 = pnand %p3934_p3, %p3931_p2 }
  0x29   :  { %3939 = shalt.err (!%p3936_p4)
}
  0x2a   :  { %s3940_s19 = scalar_lea.vmem %s40_s29, 16  ;;  %s3944_s20 = scalar_lea.vmem %s40_s29, 32 }
  0x2b   :  { %p3941_p5 = scmp.ne.s32.totalorder %s40_s29, %s3940_s19  ;;  %p3945_p6 = scmp.lt.s32.totalorder %s40_s29, %s40_s29 }
  0x2c   :  { %p3946_p7 = scmp.lt.s32.totalorder %s3944_s20, %s3940_s19 }
  0x2e   :  { %p3947_p8 = por %p3946_p7, %p3945_p6 }
  0x30   :  { %p3948_p9 = pnand %p3947_p8, %p3941_p5 }
  0x32   :  { %3951 = shalt.err (!%p3948_p9)
}
  0x33   :  { %42 = dma.hbm_to_vmem [thread:$0]  %s4183_s2, 16, %s40_s29, [#allocation6]  }
  0x34   :  { %3974 = dma.done.wait [#allocation3], 1344  }
  0x35   :  { %3975 = vsyncadd [#allocation3], 4294965952 }
  0x36   :  { %3976 = dma.done.wait [#allocation6], 86032  }
  0x37   :  { %3977 = vsyncadd [#allocation6], 4294881264  ;;  %v79_v0 = vld [vmem:[#allocation5 + $0x80] sm:$0xff]  ;;  %v80_v1 = vld [vmem:[#allocation5 + $0x88] sm:$0xff]  ;;  %v3985_v43 = vmov 1983009808   ;;  %v757_v45 = vlaneseq }
  0x38   :  { %v63_v2 = vld [vmem:[#allocation5] sm:$0xff]  ;;  %v3197_v3 = vpack.c.bf16 %v80_v1, %v79_v0  ;;  %v64_v4 = vld [vmem:[#allocation5 + $0x8] sm:$0xff]  ;;  %v81_v11 = vld [vmem:[#allocation5 + $0x90] sm:$0xff]  ;;  %v755_v44 = vunpack.c.l.s4 %v3985_v43  ;;  %s3986_s2 = smov [#allocation8]  }
  0x39   :  { %v111_v5 = vld [vmem:[#allocation5 + $0x180] sm:$0xff]  ;;  %v112_v6 = vld [vmem:[#allocation5 + $0x188] sm:$0xff]  ;;  %v3199_v7 = vpack.c.bf16 %v64_v4, %v63_v2  ;;  %v82_v13 = vld [vmem:[#allocation5 + $0x98] sm:$0xff]  ;;  %v758_v60 = vshrl.u32 %v757_v45, 7  ;;  %s2450_s22 = sshll.u32 %s3986_s2, 4  ;;  %s2451_s22 = int_to_ptr.vmem [resolvable:$true] %s2450_s22 }
  0x3a   :  { %v3229_v8 = vpack.c.bf16 %v112_v6, %v111_v5  ;;  %v95_v9 = vld [vmem:[#allocation5 + $0x100] sm:$0xff]  ;;  %v96_v10 = vld [vmem:[#allocation5 + $0x108] sm:$0xff]  ;;  %3198 = vmatprep.subr.bf16.mxu0 %v3197_v3  ;;  %v65_v14 = vld [vmem:[#allocation5 + $0x10] sm:$0xff]  ;;  %v3201_v16 = vpack.c.bf16 %v82_v13, %v81_v11  ;;  %v756_v59 = vunpack.c.0.s8 %v755_v44  ;;  %s3952_s23 = scalar_lea.vmem %s2451_s22, 32  ;;  %p3957_p11 = scmp.lt.s32.totalorder %s2451_s22, %s2451_s22 }
  0x3b   :  { %v3231_v12 = vpack.c.bf16 %v96_v10, %v95_v9  ;;  %v66_v15 = vld [vmem:[#allocation5 + $0x18] sm:$0xff]  ;;  %3200 = vmatpush3.bf16.msra.mxu0 %v3199_v7  ;;  %v113_v18 = vld [vmem:[#allocation5 + $0x190] sm:$0xff]  ;;  %v83_v23 = vld [vmem:[#allocation5 + $0xa0] sm:$0xff]  ;;  %p3953_p10 = scmp.ne.s32.totalorder %s2451_s22, %s3952_s23  ;;  %p3958_p12 = scmp.lt.s32.totalorder %s3952_s23, %s3952_s23 }
  0x3c   :  { %3230 = vmatprep.subr.bf16.mxu1 %v3229_v8  ;;  %v3203_v17 = vpack.c.bf16 %v66_v15, %v65_v14  ;;  %v114_v19 = vld [vmem:[#allocation5 + $0x198] sm:$0xff]  ;;  %v97_v20 = vld [vmem:[#allocation5 + $0x110] sm:$0xff]  ;;  %v84_v24 = vld [vmem:[#allocation5 + $0xa8] sm:$0xff]  ;;  %3202 = vmatprep.subr.bf16.mxu0 %v3201_v16  ;;  %v4043_v10 = vsub.s32 %v756_v59, %v758_v60 }
  0x3d   :  { %3232 = vmatpush3.bf16.msra.mxu1 %v3231_v12  ;;  %v3233_v21 = vpack.c.bf16 %v114_v19, %v113_v18  ;;  %v98_v22 = vld [vmem:[#allocation5 + $0x118] sm:$0xff]  ;;  %v3205_v26 = vpack.c.bf16 %v84_v24, %v83_v23  ;;  %v67_v27 = vld [vmem:[#allocation5 + $0x20] sm:$0xff]  ;;  %v68_v28 = vld [vmem:[#allocation5 + $0x28] sm:$0xff]  ;;  %p3959_p13 = por %p3958_p12, %p3957_p11 }
  0x3e   :  { %v3235_v25 = vpack.c.bf16 %v98_v22, %v97_v20  ;;  %v115_v29 = vld [vmem:[#allocation5 + $0x1a0] sm:$0xff]  ;;  %v116_v30 = vld [vmem:[#allocation5 + $0x1a8] sm:$0xff]  ;;  %v3207_v33 = vpack.c.bf16 %v68_v28, %v67_v27  ;;  %v85_v35 = vld [vmem:[#allocation5 + $0xb0] sm:$0xff] }
  0x3f   :  { %3234 = vmatprep.subr.bf16.mxu1 %v3233_v21  ;;  %v99_v31 = vld [vmem:[#allocation5 + $0x120] sm:$0xff]  ;;  %v100_v32 = vld [vmem:[#allocation5 + $0x128] sm:$0xff]  ;;  %3204 = vmatpush3.bf16.msra.mxu0 %v3203_v17  ;;  %v3237_v34 = vpack.c.bf16 %v116_v30, %v115_v29  ;;  %v86_v36 = vld [vmem:[#allocation5 + $0xb8] sm:$0xff]  ;;  %p3960_p0 = pnand %p3959_p13, %p3953_p10 }
  0x40   :  { %v69_v37 = vld [vmem:[#allocation5 + $0x30] sm:$0xff]  ;;  %3206 = vmatprep.subr.bf16.mxu0 %v3205_v26  ;;  %v3239_v38 = vpack.c.bf16 %v100_v32, %v99_v31  ;;  %v3209_v39 = vpack.c.bf16 %v86_v36, %v85_v35  ;;  %v70_v40 = vld [vmem:[#allocation5 + $0x38] sm:$0xff]  ;;  %v87_v49 = vld [vmem:[#allocation5 + $0xc0] sm:$0xff] }
  0x41   :  { %3236 = vmatpush3.bf16.msra.mxu1 %v3235_v25  ;;  %v117_v41 = vld [vmem:[#allocation5 + $0x1b0] sm:$0xff]  ;;  %v118_v42 = vld [vmem:[#allocation5 + $0x1b8] sm:$0xff]  ;;  %v88_v50 = vld [vmem:[#allocation5 + $0xc8] sm:$0xff]  ;;  %v3211_v51 = vpack.c.bf16 %v70_v40, %v69_v37 }
  0x42   :  { %3238 = vmatprep.subr.bf16.mxu1 %v3237_v34  ;;  %v3241_v46 = vpack.c.bf16 %v118_v42, %v117_v41  ;;  %v101_v47 = vld [vmem:[#allocation5 + $0x130] sm:$0xff]  ;;  %v102_v48 = vld [vmem:[#allocation5 + $0x138] sm:$0xff]  ;;  %v119_v52 = vld [vmem:[#allocation5 + $0x1c0] sm:$0xff]  ;;  %v3213_v55 = vpack.c.bf16 %v88_v50, %v87_v49 }
  0x43   :  { %3208 = vmatpush3.bf16.msra.mxu0 %v3207_v33  ;;  %v120_v53 = vld [vmem:[#allocation5 + $0x1c8] sm:$0xff]  ;;  %v3243_v54 = vpack.c.bf16 %v102_v48, %v101_v47  ;;  %v71_v56 = vld [vmem:[#allocation5 + $0x40] sm:$0xff]  ;;  %v89_v63 = vld [vmem:[#allocation5 + $0xd0] sm:$0xff] }
  0x44   :  { %3210 = vmatprep.subr.bf16.mxu0 %v3209_v39  ;;  %v72_v57 = vld [vmem:[#allocation5 + $0x48] sm:$0xff]  ;;  %v103_v58 = vld [vmem:[#allocation5 + $0x140] sm:$0xff]  ;;  %v3245_v61 = vpack.c.bf16 %v120_v53, %v119_v52  ;;  %v90_v0 = vld [vmem:[#allocation5 + $0xd8] sm:$0xff] }
  0x45   :  { %3240 = vmatpush3.bf16.msra.mxu1 %v3239_v38  ;;  %v104_v62 = vld [vmem:[#allocation5 + $0x148] sm:$0xff]  ;;  %v121_v1 = vld [vmem:[#allocation5 + $0x1d0] sm:$0xff]  ;;  %v122_v2 = vld [vmem:[#allocation5 + $0x1d8] sm:$0xff]  ;;  %v3215_v3 = vpack.c.bf16 %v72_v57, %v71_v56  ;;  %v3217_v6 = vpack.c.bf16 %v90_v0, %v89_v63 }
  0x46   :  { %3242 = vmatprep.subr.bf16.mxu1 %v3241_v46  ;;  %v73_v4 = vld [vmem:[#allocation5 + $0x50] sm:$0xff]  ;;  %v3247_v5 = vpack.c.bf16 %v104_v62, %v103_v58  ;;  %v74_v7 = vld [vmem:[#allocation5 + $0x58] sm:$0xff]  ;;  %v3249_v11 = vpack.c.bf16 %v122_v2, %v121_v1  ;;  %v91_v12 = vld [vmem:[#allocation5 + $0xe0] sm:$0xff] }
  0x47   :  { %3212 = vmatpush3.bf16.msra.mxu0 %v3211_v51  ;;  %v105_v8 = vld [vmem:[#allocation5 + $0x150] sm:$0xff]  ;;  %v106_v9 = vld [vmem:[#allocation5 + $0x158] sm:$0xff]  ;;  %v92_v13 = vld [vmem:[#allocation5 + $0xe8] sm:$0xff]  ;;  %v3219_v16 = vpack.c.bf16 %v74_v7, %v73_v4 }
  0x48   :  { %3214 = vmatprep.subr.bf16.mxu0 %v3213_v55  ;;  %v123_v14 = vld [vmem:[#allocation5 + $0x1e0] sm:$0xff]  ;;  %v124_v15 = vld [vmem:[#allocation5 + $0x1e8] sm:$0xff]  ;;  %v3251_v17 = vpack.c.bf16 %v106_v9, %v105_v8  ;;  %v3221_v19 = vpack.c.bf16 %v92_v13, %v91_v12  ;;  %v93_v27 = vld [vmem:[#allocation5 + $0xf0] sm:$0xff] }
  0x49   :  { %3244 = vmatpush3.bf16.msra.mxu1 %v3243_v54  ;;  %v52_v18 = vld [vmem:[#allocation2] sm:$0xff]  ;;  %v75_v20 = vld [vmem:[#allocation5 + $0x60] sm:$0xff]  ;;  %v3253_v25 = vpack.c.bf16 %v124_v15, %v123_v14  ;;  %v94_v28 = vld [vmem:[#allocation5 + $0xf8] sm:$0xff] }
  0x4a   :  { %3246 = vmatprep.subr.bf16.mxu1 %v3245_v61  ;;  %v76_v21 = vld [vmem:[#allocation5 + $0x68] sm:$0xff]  ;;  %v107_v22 = vld [vmem:[#allocation5 + $0x160] sm:$0xff]  ;;  %v760_v23 = vrot.slane %v52_v18, %v4043_v10  ;;  %v753_v24 = vcombine.high %v52_v18, %v52_v18  ;;  %v125_v29 = vld [vmem:[#allocation5 + $0x1f0] sm:$0xff]  ;;  %v3225_v35 = vpack.c.bf16 %v94_v28, %v93_v27 }
  0x4b   :  { %3216 = vmatpush3.bf16.msra.mxu0 %v3215_v3  ;;  %v108_v26 = vld [vmem:[#allocation5 + $0x168] sm:$0xff]  ;;  %v126_v30 = vld [vmem:[#allocation5 + $0x1f8] sm:$0xff]  ;;  %v3223_v33 = vpack.c.bf16 %v76_v21, %v75_v20  ;;  %v77_v36 = vld [vmem:[#allocation5 + $0x70] sm:$0xff] }
  0x4c   :  { %3218 = vmatprep.subr.bf16.mxu0 %v3217_v6  ;;  %v768_v31 = vcombine.high %v760_v23, %v760_v23  ;;  %v767_v32 = vrot.slane %v753_v24, %v4043_v10  ;;  %v3255_v34 = vpack.c.bf16 %v108_v26, %v107_v22  ;;  %v78_v37 = vld [vmem:[#allocation5 + $0x78] sm:$0xff]  ;;  %v109_v38 = vld [vmem:[#allocation5 + $0x170] sm:$0xff]  ;;  %v3257_v40 = vpack.c.bf16 %v126_v30, %v125_v29  ;;  %v143_v42 = vld [vmem:[#allocation5 + $0x280] sm:$0xff] }
  0x4d   :  { %3248 = vmatpush3.bf16.msra.mxu1 %v3247_v5  ;;  %v110_v41 = vld [vmem:[#allocation5 + $0x178] sm:$0xff]  ;;  %v144_v43 = vld [vmem:[#allocation5 + $0x288] sm:$0xff]  ;;  %v175_v44 = vld [vmem:[#allocation5 + $0x380] sm:$0xff]  ;;  %v3227_v46 = vpack.c.bf16 %v78_v37, %v77_v36 }
  0x4e   :  { %3250 = vmatprep.subr.bf16.mxu1 %v3249_v11  ;;  %v769_v39 = vcombine.high %v767_v32, %v767_v32  ;;  %1037 = vmatprep.mubr.f32.mxu0 %v768_v31  ;;  %v176_v45 = vld [vmem:[#allocation5 + $0x388] sm:$0xff]  ;;  %v3259_v47 = vpack.c.bf16 %v110_v41, %v109_v38  ;;  %v3261_v48 = vpack.c.bf16 %v144_v43, %v143_v42  ;;  %v127_v49 = vld [vmem:[#allocation5 + $0x200] sm:$0xff]  ;;  %v145_v54 = vld [vmem:[#allocation5 + $0x290] sm:$0xff] }
  0x4f   :  { %3220 = vmatpush3.bf16.msra.mxu0 %v3219_v16  ;;  %v128_v50 = vld [vmem:[#allocation5 + $0x208] sm:$0xff]  ;;  %v159_v51 = vld [vmem:[#allocation5 + $0x300] sm:$0xff]  ;;  %v3293_v52 = vpack.c.bf16 %v176_v45, %v175_v44  ;;  %v146_v55 = vld [vmem:[#allocation5 + $0x298] sm:$0xff] }
  0x50   :  { %3222 = vmatprep.subr.bf16.mxu0 %v3221_v19  ;;  %1107 = vmatprep.mubr.f32.mxu1 %v769_v39  ;;  %v160_v53 = vld [vmem:[#allocation5 + $0x308] sm:$0xff]  ;;  %v177_v56 = vld [vmem:[#allocation5 + $0x390] sm:$0xff]  ;;  %v178_v57 = vld [vmem:[#allocation5 + $0x398] sm:$0xff]  ;;  %v3263_v58 = vpack.c.bf16 %v128_v50, %v127_v49  ;;  %v3265_v60 = vpack.c.bf16 %v146_v55, %v145_v54 }
  0x51   :  { %3252 = vmatpush3.bf16.msra.mxu1 %v3251_v17  ;;  %v3295_v59 = vpack.c.bf16 %v160_v53, %v159_v51  ;;  %v129_v61 = vld [vmem:[#allocation5 + $0x210] sm:$0xff]  ;;  %v130_v62 = vld [vmem:[#allocation5 + $0x218] sm:$0xff]  ;;  %v3297_v0 = vpack.c.bf16 %v178_v57, %v177_v56  ;;  %v147_v2 = vld [vmem:[#allocation5 + $0x2a0] sm:$0xff] }
  0x52   :  { %3254 = vmatprep.subr.bf16.mxu1 %v3253_v25  ;;  %v161_v63 = vld [vmem:[#allocation5 + $0x310] sm:$0xff]  ;;  %v162_v1 = vld [vmem:[#allocation5 + $0x318] sm:$0xff]  ;;  %v148_v3 = vld [vmem:[#allocation5 + $0x2a8] sm:$0xff]  ;;  %v3267_v6 = vpack.c.bf16 %v130_v62, %v129_v61 }
  0x53   :  { %3224 = vmatpush3.bf16.msra.mxu0 %v3223_v33  ;;  %v179_v4 = vld [vmem:[#allocation5 + $0x3a0] sm:$0xff]  ;;  %v180_v5 = vld [vmem:[#allocation5 + $0x3a8] sm:$0xff]  ;;  %v3299_v7 = vpack.c.bf16 %v162_v1, %v161_v63  ;;  %v3269_v8 = vpack.c.bf16 %v148_v3, %v147_v2  ;;  %v149_v15 = vld [vmem:[#allocation5 + $0x2b0] sm:$0xff] }
  0x54   :  { %3226 = vmatprep.subr.bf16.mxu0 %v3225_v35  ;;  %v131_v9 = vld [vmem:[#allocation5 + $0x220] sm:$0xff]  ;;  %v132_v11 = vld [vmem:[#allocation5 + $0x228] sm:$0xff]  ;;  %v3301_v13 = vpack.c.bf16 %v180_v5, %v179_v4  ;;  %v150_v16 = vld [vmem:[#allocation5 + $0x2b8] sm:$0xff] }
  0x55   :  { %3256 = vmatpush3.bf16.msra.mxu1 %v3255_v34  ;;  %v163_v12 = vld [vmem:[#allocation5 + $0x320] sm:$0xff]  ;;  %v164_v14 = vld [vmem:[#allocation5 + $0x328] sm:$0xff]  ;;  %v181_v17 = vld [vmem:[#allocation5 + $0x3b0] sm:$0xff]  ;;  %v3271_v19 = vpack.c.bf16 %v132_v11, %v131_v9  ;;  %v3273_v22 = vpack.c.bf16 %v150_v16, %v149_v15 }
  0x56   :  { %3258 = vmatprep.subr.bf16.mxu1 %v3257_v40  ;;  %v182_v18 = vld [vmem:[#allocation5 + $0x3b8] sm:$0xff]  ;;  %v133_v20 = vld [vmem:[#allocation5 + $0x230] sm:$0xff]  ;;  %v3303_v21 = vpack.c.bf16 %v164_v14, %v163_v12  ;;  %v151_v27 = vld [vmem:[#allocation5 + $0x2c0] sm:$0xff] }
  0x57   :  { %3228 = vmatpush3.bf16.msra.mxu0 %v3227_v46  ;;  %v165_v24 = vld [vmem:[#allocation5 + $0x330] sm:$0xff]  ;;  %v166_v25 = vld [vmem:[#allocation5 + $0x338] sm:$0xff]  ;;  %v3305_v26 = vpack.c.bf16 %v182_v18, %v181_v17  ;;  %v152_v28 = vld [vmem:[#allocation5 + $0x2c8] sm:$0xff] }
  0x58   :  { %3262 = vmatprep.subr.bf16.mxu0 %v3261_v48  ;;  %v53_v29 = vld [vmem:[#allocation2 + $0x8] sm:$0xff]  ;;  %v183_v30 = vld [vmem:[#allocation5 + $0x3c0] sm:$0xff]  ;;  %v184_v31 = vld [vmem:[#allocation5 + $0x3c8] sm:$0xff]  ;;  %v3307_v35 = vpack.c.bf16 %v166_v25, %v165_v24  ;;  %v3277_v36 = vpack.c.bf16 %v152_v28, %v151_v27 }
  0x59   :  { %3260 = vmatpush3.bf16.msra.mxu1 %v3259_v47  ;;  %v770_v33 = vcombine.high %v53_v29, %v53_v29  ;;  %v135_v37 = vld [vmem:[#allocation5 + $0x240] sm:$0xff]  ;;  %v136_v38 = vld [vmem:[#allocation5 + $0x248] sm:$0xff]  ;;  %v3309_v42 = vpack.c.bf16 %v184_v31, %v183_v30  ;;  %v153_v44 = vld [vmem:[#allocation5 + $0x2d0] sm:$0xff] }
  0x5a   :  { %3294 = vmatprep.subr.bf16.mxu1 %v3293_v52  ;;  %1038 = vmatmul.mubr.f32.vlgmr.msra.gmra.mrb[0].mxu0 %v760_v23  ;;  %v134_v23 = vld [vmem:[#allocation5 + $0x238] sm:$0xff]  ;;  %v167_v39 = vld [vmem:[#allocation5 + $0x340] sm:$0xff]  ;;  %v168_v43 = vld [vmem:[#allocation5 + $0x348] sm:$0xff]  ;;  %v3279_v49 = vpack.c.bf16 %v136_v38, %v135_v37 }
  0x5b   :  { %3264 = vmatpush3.bf16.msra.mxu0 %v3263_v58  ;;  %v3275_v34 = vpack.c.bf16 %v134_v23, %v133_v20  ;;  %v4053_v41 = vrot.slane %v770_v33, %v4043_v10  ;;  %v154_v45 = vld [vmem:[#allocation5 + $0x2d8] sm:$0xff]  ;;  %v185_v46 = vld [vmem:[#allocation5 + $0x3d0] sm:$0xff]  ;;  %v3311_v50 = vpack.c.bf16 %v168_v43, %v167_v39  ;;  %v155_v57 = vld [vmem:[#allocation5 + $0x2e0] sm:$0xff] }
  0x5c   :  { %1108 = vmatmul.mubr.f32.vlgmr.msra.gmra.mrb[0].mxu1 %v767_v32  ;;  %3266 = vmatprep.subr.bf16.mxu0 %v3265_v60  ;;  %v4048_v32 = vrot.slane %v53_v29, %v4043_v10  ;;  %v186_v47 = vld [vmem:[#allocation5 + $0x3d8] sm:$0xff]  ;;  %v3281_v51 = vpack.c.bf16 %v154_v45, %v153_v44  ;;  %v137_v52 = vld [vmem:[#allocation5 + $0x250] sm:$0xff]  ;;  %v156_v58 = vld [vmem:[#allocation5 + $0x2e8] sm:$0xff] }
  0x5d   :  { %3296 = vmatpush3.bf16.msra.mxu1 %v3295_v59  ;;  %v786_v48 = vcombine.high %v4053_v41, %v4053_v41  ;;  %v138_v53 = vld [vmem:[#allocation5 + $0x258] sm:$0xff]  ;;  %v169_v54 = vld [vmem:[#allocation5 + $0x350] sm:$0xff]  ;;  %v3313_v55 = vpack.c.bf16 %v186_v47, %v185_v46  ;;  %v187_v59 = vld [vmem:[#allocation5 + $0x3e0] sm:$0xff]  ;;  %v3285_v63 = vpack.c.bf16 %v156_v58, %v155_v57 }
  0x5e   :  { %3298 = vmatprep.subr.bf16.mxu1 %v3297_v0  ;;  %v785_v40 = vcombine.high %v4048_v32, %v4048_v32  ;;  %v170_v56 = vld [vmem:[#allocation5 + $0x358] sm:$0xff]  ;;  %v188_v60 = vld [vmem:[#allocation5 + $0x3e8] sm:$0xff]  ;;  %v3283_v61 = vpack.c.bf16 %v138_v53, %v137_v52  ;;  %v139_v0 = vld [vmem:[#allocation5 + $0x260] sm:$0xff] }
  0x5f   :  { %3268 = vmatpush3.bf16.msra.mxu0 %v3267_v6  ;;  %1247 = vmatprep.mubr.f32.mxu1 %v786_v48  ;;  %v3315_v62 = vpack.c.bf16 %v170_v56, %v169_v54  ;;  %v140_v1 = vld [vmem:[#allocation5 + $0x268] sm:$0xff]  ;;  %v171_v2 = vld [vmem:[#allocation5 + $0x360] sm:$0xff]  ;;  %v3317_v3 = vpack.c.bf16 %v188_v60, %v187_v59  ;;  %v157_v5 = vld [vmem:[#allocation5 + $0x2f0] sm:$0xff] }
  0x60   :  { %3270 = vmatprep.subr.bf16.mxu0 %v3269_v8  ;;  %1177 = vmatprep.mubr.f32.mxu0 %v785_v40  ;;  %v172_v4 = vld [vmem:[#allocation5 + $0x368] sm:$0xff]  ;;  %v158_v6 = vld [vmem:[#allocation5 + $0x2f8] sm:$0xff]  ;;  %v3287_v9 = vpack.c.bf16 %v140_v1, %v139_v0  ;;  %v173_v15 = vld [vmem:[#allocation5 + $0x370] sm:$0xff] }
  0x61   :  { %3300 = vmatpush3.bf16.msra.mxu1 %v3299_v7  ;;  %v189_v7 = vld [vmem:[#allocation5 + $0x3f0] sm:$0xff]  ;;  %v190_v8 = vld [vmem:[#allocation5 + $0x3f8] sm:$0xff]  ;;  %v3319_v11 = vpack.c.bf16 %v172_v4, %v171_v2  ;;  %v3289_v12 = vpack.c.bf16 %v158_v6, %v157_v5  ;;  %v207_v18 = vld [vmem:[#allocation5 + $0x480] sm:$0xff] }
  0x62   :  { %3302 = vmatprep.subr.bf16.mxu1 %v3301_v13  ;;  %v141_v13 = vld [vmem:[#allocation5 + $0x270] sm:$0xff]  ;;  %v142_v14 = vld [vmem:[#allocation5 + $0x278] sm:$0xff]  ;;  %v3321_v16 = vpack.c.bf16 %v190_v8, %v189_v7  ;;  %v239_v20 = vld [vmem:[#allocation5 + $0x580] sm:$0xff] }
  0x63   :  { %3272 = vmatpush3.bf16.msra.mxu0 %v3271_v19  ;;  %v174_v17 = vld [vmem:[#allocation5 + $0x378] sm:$0xff]  ;;  %v208_v19 = vld [vmem:[#allocation5 + $0x488] sm:$0xff]  ;;  %v191_v23 = vld [vmem:[#allocation5 + $0x400] sm:$0xff] }
  0x64   :  { %3274 = vmatprep.subr.bf16.mxu0 %v3273_v22  ;;  %v3291_v22 = vpack.c.bf16 %v142_v14, %v141_v13  ;;  %v3323_v24 = vpack.c.bf16 %v174_v17, %v173_v15  ;;  %v3325_v25 = vpack.c.bf16 %v208_v19, %v207_v18  ;;  %v223_v27 = vld [vmem:[#allocation5 + $0x500] sm:$0xff]  ;;  %v224_v28 = vld [vmem:[#allocation5 + $0x508] sm:$0xff]  ;;  %v209_v30 = vld [vmem:[#allocation5 + $0x490] sm:$0xff] }
  0x65   :  { %3304 = vmatpush3.bf16.msra.mxu1 %v3303_v21  ;;  %v240_v21 = vld [vmem:[#allocation5 + $0x588] sm:$0xff]  ;;  %v210_v31 = vld [vmem:[#allocation5 + $0x498] sm:$0xff]  ;;  %v241_v33 = vld [vmem:[#allocation5 + $0x590] sm:$0xff] }
  0x66   :  { %3306 = vmatprep.subr.bf16.mxu1 %v3305_v26  ;;  %v192_v26 = vld [vmem:[#allocation5 + $0x408] sm:$0xff]  ;;  %v3357_v29 = vpack.c.bf16 %v240_v21, %v239_v20  ;;  %v54_v37 = vld [vmem:[#allocation2 + $0x10] sm:$0xff]  ;;  %v3329_v38 = vpack.c.bf16 %v210_v31, %v209_v30  ;;  %v193_v39 = vld [vmem:[#allocation5 + $0x410] sm:$0xff] }
  0x67   :  { %3276 = vmatpush3.bf16.msra.mxu0 %v3275_v34  ;;  %v242_v34 = vld [vmem:[#allocation5 + $0x598] sm:$0xff]  ;;  %v4058_v43 = vrot.slane %v54_v37, %v4043_v10  ;;  %v787_v44 = vcombine.high %v54_v37, %v54_v37  ;;  %v211_v47 = vld [vmem:[#allocation5 + $0x4a0] sm:$0xff]  ;;  %v212_v48 = vld [vmem:[#allocation5 + $0x4a8] sm:$0xff] }
  0x68   :  { %3278 = vmatprep.subr.bf16.mxu0 %v3277_v36  ;;  %v3359_v36 = vpack.c.bf16 %v224_v28, %v223_v27  ;;  %v194_v40 = vld [vmem:[#allocation5 + $0x418] sm:$0xff]  ;;  %v3361_v45 = vpack.c.bf16 %v242_v34, %v241_v33  ;;  %v195_v56 = vld [vmem:[#allocation5 + $0x420] sm:$0xff]  ;;  %v196_v57 = vld [vmem:[#allocation5 + $0x428] sm:$0xff] }
  0x69   :  { %3308 = vmatpush3.bf16.msra.mxu1 %v3307_v35  ;;  %v3327_v35 = vpack.c.bf16 %v192_v26, %v191_v23  ;;  %v226_v46 = vld [vmem:[#allocation5 + $0x518] sm:$0xff]  ;;  %v4064_v52 = vrot.slane %v787_v44, %v4043_v10  ;;  %v3331_v53 = vpack.c.bf16 %v194_v40, %v193_v39  ;;  %v227_v58 = vld [vmem:[#allocation5 + $0x520] sm:$0xff]  ;;  %v228_v60 = vld [vmem:[#allocation5 + $0x528] sm:$0xff] }
  0x6a   :  { %3310 = vmatprep.subr.bf16.mxu1 %v3309_v42  ;;  %v225_v42 = vld [vmem:[#allocation5 + $0x510] sm:$0xff]  ;;  %v246_v0 = vld [vmem:[#allocation5 + $0x5b8] sm:$0xff]  ;;  %v3367_v1 = vpack.c.bf16 %v228_v60, %v227_v58  ;;  %v215_v8 = vld [vmem:[#allocation5 + $0x4c0] sm:$0xff] }
  0x6b   :  { %3280 = vmatpush3.bf16.msra.mxu0 %v3279_v49  ;;  %v243_v49 = vld [vmem:[#allocation5 + $0x5a0] sm:$0xff]  ;;  %v3363_v54 = vpack.c.bf16 %v226_v46, %v225_v42  ;;  %v198_v4 = vld [vmem:[#allocation5 + $0x438] sm:$0xff]  ;;  %v229_v5 = vld [vmem:[#allocation5 + $0x530] sm:$0xff] }
  0x6c   :  { %3282 = vmatprep.subr.bf16.mxu0 %v3281_v51  ;;  %v802_v51 = vcombine.high %v4058_v43, %v4058_v43  ;;  %v230_v7 = vld [vmem:[#allocation5 + $0x538] sm:$0xff]  ;;  %v200_v17 = vld [vmem:[#allocation5 + $0x448] sm:$0xff]  ;;  %v231_v18 = vld [vmem:[#allocation5 + $0x540] sm:$0xff] }
  0x6d   :  { %3312 = vmatpush3.bf16.msra.mxu1 %v3311_v50  ;;  %v244_v50 = vld [vmem:[#allocation5 + $0x5a8] sm:$0xff]  ;;  %v3371_v14 = vpack.c.bf16 %v230_v7, %v229_v5  ;;  %v217_v21 = vld [vmem:[#allocation5 + $0x4d0] sm:$0xff]  ;;  %v234_v33 = vld [vmem:[#allocation5 + $0x558] sm:$0xff] }
  0x6e   :  { %3314 = vmatprep.subr.bf16.mxu1 %v3313_v55  ;;  %v3333_v55 = vpack.c.bf16 %v212_v48, %v211_v47  ;;  %v3365_v59 = vpack.c.bf16 %v244_v50, %v243_v49  ;;  %v232_v20 = vld [vmem:[#allocation5 + $0x548] sm:$0xff]  ;;  %v249_v23 = vld [vmem:[#allocation5 + $0x5d0] sm:$0xff]  ;;  %v219_v34 = vld [vmem:[#allocation5 + $0x4e0] sm:$0xff] }
  0x6f   :  { %3284 = vmatpush3.bf16.msra.mxu0 %v3283_v61  ;;  %v213_v61 = vld [vmem:[#allocation5 + $0x4b0] sm:$0xff]  ;;  %v3375_v26 = vpack.c.bf16 %v232_v20, %v231_v18  ;;  %v252_v37 = vld [vmem:[#allocation5 + $0x5e8] sm:$0xff]  ;;  %v203_v42 = vld [vmem:[#allocation5 + $0x460] sm:$0xff] }
  0x70   :  { %3286 = vmatprep.subr.bf16.mxu0 %v3285_v63  ;;  %v245_v63 = vld [vmem:[#allocation5 + $0x5b0] sm:$0xff]  ;;  %v204_v44 = vld [vmem:[#allocation5 + $0x468] sm:$0xff]  ;;  %v222_v49 = vld [vmem:[#allocation5 + $0x4f8] sm:$0xff] }
  0x71   :  { %3316 = vmatpush3.bf16.msra.mxu1 %v3315_v62  ;;  %v214_v62 = vld [vmem:[#allocation5 + $0x4b8] sm:$0xff]  ;;  %v3369_v6 = vpack.c.bf16 %v246_v0, %v245_v63  ;;  %v201_v28 = vld [vmem:[#allocation5 + $0x450] sm:$0xff]  ;;  %v236_v47 = vld [vmem:[#allocation5 + $0x568] sm:$0xff] }
  0x72   :  { %3318 = vmatprep.subr.bf16.mxu1 %v3317_v3  ;;  %v3337_v2 = vpack.c.bf16 %v214_v62, %v213_v61  ;;  %v197_v3 = vld [vmem:[#allocation5 + $0x430] sm:$0xff]  ;;  %v206_v58 = vld [vmem:[#allocation5 + $0x478] sm:$0xff]  ;;  %v271_v61 = vld [vmem:[#allocation5 + $0x680] sm:$0xff] }
  0x73   :  { %3288 = vmatpush3.bf16.msra.mxu0 %v3287_v9  ;;  %v216_v9 = vld [vmem:[#allocation5 + $0x4c8] sm:$0xff]  ;;  %v3339_v13 = vpack.c.bf16 %v198_v4, %v197_v3  ;;  %v233_v30 = vld [vmem:[#allocation5 + $0x550] sm:$0xff]  ;;  %v238_v60 = vld [vmem:[#allocation5 + $0x578] sm:$0xff] }
  0x74   :  { %3290 = vmatprep.subr.bf16.mxu0 %v3289_v12  ;;  %v248_v12 = vld [vmem:[#allocation5 + $0x5c8] sm:$0xff]  ;;  %v3341_v15 = vpack.c.bf16 %v216_v9, %v215_v8  ;;  %v3379_v39 = vpack.c.bf16 %v234_v33, %v233_v30  ;;  %v221_v48 = vld [vmem:[#allocation5 + $0x4f0] sm:$0xff]  ;;  %v303_v63 = vld [vmem:[#allocation5 + $0x780] sm:$0xff] }
  0x75   :  { %3320 = vmatpush3.bf16.msra.mxu1 %v3319_v11  ;;  %v247_v11 = vld [vmem:[#allocation5 + $0x5c0] sm:$0xff]  ;;  %v253_v50 = vld [vmem:[#allocation5 + $0x5f0] sm:$0xff]  ;;  %v272_v62 = vld [vmem:[#allocation5 + $0x688] sm:$0xff] }
  0x76   :  { %3322 = vmatprep.subr.bf16.mxu1 %v3321_v16  ;;  %v199_v16 = vld [vmem:[#allocation5 + $0x440] sm:$0xff]  ;;  %v3373_v19 = vpack.c.bf16 %v248_v12, %v247_v11  ;;  %v304_v0 = vld [vmem:[#allocation5 + $0x788] sm:$0xff]  ;;  %v3389_v3 = vpack.c.bf16 %v272_v62, %v271_v61  ;;  %v273_v9 = vld [vmem:[#allocation5 + $0x690] sm:$0xff] }
  0x77   :  { %3292 = vmatpush3.bf16.msra.mxu0 %v3291_v22  ;;  %v218_v22 = vld [vmem:[#allocation5 + $0x4d8] sm:$0xff]  ;;  %v255_v4 = vld [vmem:[#allocation5 + $0x600] sm:$0xff]  ;;  %v256_v5 = vld [vmem:[#allocation5 + $0x608] sm:$0xff]  ;;  %v3421_v7 = vpack.c.bf16 %v304_v0, %v303_v63 }
  0x78   :  { %3326 = vmatprep.subr.bf16.mxu0 %v3325_v25  ;;  %v3343_v25 = vpack.c.bf16 %v200_v17, %v199_v16  ;;  %v3345_v27 = vpack.c.bf16 %v218_v22, %v217_v21  ;;  %v288_v8 = vld [vmem:[#allocation5 + $0x708] sm:$0xff]  ;;  %v274_v11 = vld [vmem:[#allocation5 + $0x698] sm:$0xff]  ;;  %v3391_v16 = vpack.c.bf16 %v256_v5, %v255_v4  ;;  %v289_v21 = vld [vmem:[#allocation5 + $0x710] sm:$0xff] }
  0x79   :  { %3324 = vmatpush3.bf16.msra.mxu1 %v3323_v24  ;;  %v250_v24 = vld [vmem:[#allocation5 + $0x5d8] sm:$0xff]  ;;  %v3393_v18 = vpack.c.bf16 %v274_v11, %v273_v9  ;;  %v296_v62 = vld [vmem:[#allocation5 + $0x748] sm:$0xff]  ;;  %v281_v63 = vld [vmem:[#allocation5 + $0x6d0] sm:$0xff] }
  0x7a   :  { %3358 = vmatprep.subr.bf16.mxu1 %v3357_v29  ;;  %1178 = vmatmul.mubr.f32.vlgmr.msra.gmra.mrb[2].mxu0 %v4048_v32  ;;  %v803_v32 = vcombine.high %v4064_v52, %v4064_v52  ;;  %v202_v29 = vld [vmem:[#allocation5 + $0x458] sm:$0xff]  ;;  %v3377_v31 = vpack.c.bf16 %v250_v24, %v249_v23  ;;  %v275_v24 = vld [vmem:[#allocation5 + $0x6a0] sm:$0xff]  ;;  %v265_v5 = vld [vmem:[#allocation5 + $0x650] sm:$0xff] }
  0x7b   :  { %3328 = vmatpush3.bf16.msra.mxu0 %v3327_v35  ;;  %1317 = vmatprep.mubr.f32.mxu0 %v802_v51  ;;  %v220_v35 = vld [vmem:[#allocation5 + $0x4e8] sm:$0xff]  ;;  %v254_v51 = vld [vmem:[#allocation5 + $0x5f8] sm:$0xff]  ;;  %v283_v11 = vld [vmem:[#allocation5 + $0x6e0] sm:$0xff] }
  0x7c   :  { %1248 = vmatmul.mubr.f32.vlgmr.msra.gmra.mrb[2].mxu1 %v4053_v41  ;;  %3330 = vmatprep.subr.bf16.mxu0 %v3329_v38  ;;  %v3335_v41 = vpack.c.bf16 %v196_v57, %v195_v56  ;;  %v3347_v38 = vpack.c.bf16 %v202_v29, %v201_v28  ;;  %v3349_v40 = vpack.c.bf16 %v220_v35, %v219_v34  ;;  %v205_v57 = vld [vmem:[#allocation5 + $0x470] sm:$0xff]  ;;  %v258_v20 = vld [vmem:[#allocation5 + $0x618] sm:$0xff]  ;;  %v308_v28 = vld [vmem:[#allocation5 + $0x7a8] sm:$0xff] }
  0x7d   :  { %3360 = vmatpush3.bf16.msra.mxu1 %v3359_v36  ;;  %1387 = vmatprep.mubr.f32.mxu1 %v803_v32  ;;  %v251_v36 = vld [vmem:[#allocation5 + $0x5e0] sm:$0xff]  ;;  %v3353_v56 = vpack.c.bf16 %v222_v49, %v221_v48  ;;  %v237_v32 = vld [vmem:[#allocation5 + $0x570] sm:$0xff]  ;;  %v290_v23 = vld [vmem:[#allocation5 + $0x718] sm:$0xff] }
  0x7e   :  { %3362 = vmatprep.subr.bf16.mxu1 %v3361_v45  ;;  %v235_v45 = vld [vmem:[#allocation5 + $0x560] sm:$0xff]  ;;  %v3381_v46 = vpack.c.bf16 %v252_v37, %v251_v36  ;;  %v260_v35 = vld [vmem:[#allocation5 + $0x628] sm:$0xff]  ;;  %v293_v48 = vld [vmem:[#allocation5 + $0x730] sm:$0xff] }
  0x7f   :  { %3332 = vmatpush3.bf16.msra.mxu0 %v3331_v53  ;;  %v3351_v53 = vpack.c.bf16 %v204_v44, %v203_v42  ;;  %v259_v34 = vld [vmem:[#allocation5 + $0x620] sm:$0xff]  ;;  %v310_v42 = vld [vmem:[#allocation5 + $0x7b8] sm:$0xff] }
  0x80   :  { %3334 = vmatprep.subr.bf16.mxu0 %v3333_v55  ;;  %v3383_v55 = vpack.c.bf16 %v236_v47, %v235_v45  ;;  %v291_v36 = vld [vmem:[#allocation5 + $0x720] sm:$0xff]  ;;  %v3399_v44 = vpack.c.bf16 %v260_v35, %v259_v34  ;;  %v262_v47 = vld [vmem:[#allocation5 + $0x638] sm:$0xff]  ;;  %v269_v34 = vld [vmem:[#allocation5 + $0x670] sm:$0xff] }
  0x81   :  { %3364 = vmatpush3.bf16.msra.mxu1 %v3363_v54  ;;  %v55_v54 = vld [vmem:[#allocation2 + $0x18] sm:$0xff]  ;;  %v282_v0 = vld [vmem:[#allocation5 + $0x6d8] sm:$0xff] }
  0x82   :  { %3366 = vmatprep.subr.bf16.mxu1 %v3365_v59  ;;  %v3385_v59 = vpack.c.bf16 %v254_v51, %v253_v50  ;;  %v4070_v12 = vrot.slane %v55_v54, %v4043_v10  ;;  %v294_v50 = vld [vmem:[#allocation5 + $0x738] sm:$0xff]  ;;  %v279_v51 = vld [vmem:[#allocation5 + $0x6c0] sm:$0xff]  ;;  %v3409_v4 = vpack.c.bf16 %v282_v0, %v281_v63  ;;  %v353_v63 = vld [vmem:[#allocation5 + $0x910] sm:$0xff] }
  0x83   :  { %3336 = vmatpush3.bf16.msra.mxu0 %v3335_v41  ;;  %v804_v41 = vcombine.high %v55_v54, %v55_v54  ;;  %v311_v54 = vld [vmem:[#allocation5 + $0x7c0] sm:$0xff]  ;;  %v298_v9 = vld [vmem:[#allocation5 + $0x758] sm:$0xff] }
  0x84   :  { %3338 = vmatprep.subr.bf16.mxu0 %v3337_v2  ;;  %v3387_v2 = vpack.c.bf16 %v238_v60, %v237_v32  ;;  %v263_v32 = vld [vmem:[#allocation5 + $0x640] sm:$0xff]  ;;  %v270_v35 = vld [vmem:[#allocation5 + $0x678] sm:$0xff] }
  0x85   :  { %3368 = vmatpush3.bf16.msra.mxu1 %v3367_v1  ;;  %v3355_v1 = vpack.c.bf16 %v206_v58, %v205_v57  ;;  %v3435_v57 = vpack.c.bf16 %v294_v50, %v293_v48  ;;  %v295_v60 = vld [vmem:[#allocation5 + $0x740] sm:$0xff]  ;;  %v320_v48 = vld [vmem:[#allocation5 + $0x808] sm:$0xff] }
  0x86   :  { %3370 = vmatprep.subr.bf16.mxu1 %v3369_v6  ;;  %v287_v6 = vld [vmem:[#allocation5 + $0x700] sm:$0xff] }
  0x87   :  { %3340 = vmatpush3.bf16.msra.mxu0 %v3339_v13  ;;  %v305_v13 = vld [vmem:[#allocation5 + $0x790] sm:$0xff]  ;;  %v3423_v17 = vpack.c.bf16 %v288_v8, %v287_v6  ;;  %v266_v6 = vld [vmem:[#allocation5 + $0x658] sm:$0xff] }
  0x88   :  { %3342 = vmatprep.subr.bf16.mxu0 %v3341_v15  ;;  %v4073_v15 = vrot.slane %v804_v41, %v4043_v10  ;;  %v313_v41 = vld [vmem:[#allocation5 + $0x7d0] sm:$0xff] }
  0x89   :  { %3372 = vmatpush3.bf16.msra.mxu1 %v3371_v14  ;;  %v306_v14 = vld [vmem:[#allocation5 + $0x798] sm:$0xff] }
  0x8a   :  { %3374 = vmatprep.subr.bf16.mxu1 %v3373_v19  ;;  %v257_v19 = vld [vmem:[#allocation5 + $0x610] sm:$0xff]  ;;  %v3425_v22 = vpack.c.bf16 %v306_v14, %v305_v13  ;;  %v820_v29 = vcombine.high %v4073_v15, %v4073_v15  ;;  %v284_v13 = vld [vmem:[#allocation5 + $0x6e8] sm:$0xff]  ;;  %v315_v14 = vld [vmem:[#allocation5 + $0x7e0] sm:$0xff] }
  0x8b   :  { %3344 = vmatpush3.bf16.msra.mxu0 %v3343_v25  ;;  %v276_v25 = vld [vmem:[#allocation5 + $0x6a8] sm:$0xff]  ;;  %v3395_v30 = vpack.c.bf16 %v258_v20, %v257_v19  ;;  %v3413_v19 = vpack.c.bf16 %v284_v13, %v283_v11  ;;  %v267_v20 = vld [vmem:[#allocation5 + $0x660] sm:$0xff] }
  0x8c   :  { %3346 = vmatprep.subr.bf16.mxu0 %v3345_v27  ;;  %v307_v27 = vld [vmem:[#allocation5 + $0x7a0] sm:$0xff]  ;;  %v3397_v33 = vpack.c.bf16 %v276_v25, %v275_v24  ;;  %v300_v24 = vld [vmem:[#allocation5 + $0x768] sm:$0xff]  ;;  %v285_v25 = vld [vmem:[#allocation5 + $0x6f0] sm:$0xff] }
  0x8d   :  { %3376 = vmatpush3.bf16.msra.mxu1 %v3375_v26  ;;  %v819_v26 = vcombine.high %v4070_v12, %v4070_v12  ;;  %v3429_v37 = vpack.c.bf16 %v308_v28, %v307_v27  ;;  %v317_v27 = vld [vmem:[#allocation5 + $0x7f0] sm:$0xff]  ;;  %v318_v28 = vld [vmem:[#allocation5 + $0x7f8] sm:$0xff]  ;;  %v323_v11 = vld [vmem:[#allocation5 + $0x820] sm:$0xff] }
  0x8e   :  { %3378 = vmatprep.subr.bf16.mxu1 %v3377_v31  ;;  %v3427_v31 = vpack.c.bf16 %v290_v23, %v289_v21  ;;  %v268_v21 = vld [vmem:[#allocation5 + $0x668] sm:$0xff] }
  0x8f   :  { %3348 = vmatpush3.bf16.msra.mxu0 %v3347_v38  ;;  %v292_v38 = vld [vmem:[#allocation5 + $0x728] sm:$0xff] }
  0x90   :  { %3350 = vmatprep.subr.bf16.mxu0 %v3349_v40  ;;  %v309_v40 = vld [vmem:[#allocation5 + $0x7b0] sm:$0xff]  ;;  %v324_v13 = vld [vmem:[#allocation5 + $0x828] sm:$0xff] }
  0x91   :  { %3380 = vmatpush3.bf16.msra.mxu1 %v3379_v39  ;;  %v278_v39 = vld [vmem:[#allocation5 + $0x6b8] sm:$0xff]  ;;  %v3433_v49 = vpack.c.bf16 %v310_v42, %v309_v40  ;;  %v367_v40 = vld [vmem:[#allocation5 + $0x980] sm:$0xff]  ;;  %v368_v42 = vld [vmem:[#allocation5 + $0x988] sm:$0xff] }
  0x92   :  { %3382 = vmatprep.subr.bf16.mxu1 %v3381_v46  ;;  %v261_v46 = vld [vmem:[#allocation5 + $0x630] sm:$0xff]  ;;  %v3485_v50 = vpack.c.bf16 %v368_v42, %v367_v40  ;;  %v346_v42 = vld [vmem:[#allocation5 + $0x8d8] sm:$0xff] }
  0x93   :  { %3352 = vmatpush3.bf16.msra.mxu0 %v3351_v53  ;;  %v280_v53 = vld [vmem:[#allocation5 + $0x6c8] sm:$0xff]  ;;  %v345_v40 = vld [vmem:[#allocation5 + $0x8d0] sm:$0xff] }
  0x94   :  { %3354 = vmatprep.subr.bf16.mxu0 %v3353_v56  ;;  %v3403_v56 = vpack.c.bf16 %v262_v47, %v261_v46  ;;  %v3405_v58 = vpack.c.bf16 %v280_v53, %v279_v51  ;;  %v319_v47 = vld [vmem:[#allocation5 + $0x800] sm:$0xff]  ;;  %v352_v51 = vld [vmem:[#allocation5 + $0x908] sm:$0xff]  ;;  %v337_v53 = vld [vmem:[#allocation5 + $0x890] sm:$0xff] }
  0x95   :  { %3384 = vmatpush3.bf16.msra.mxu1 %v3383_v55  ;;  %v312_v55 = vld [vmem:[#allocation5 + $0x7c8] sm:$0xff] }
  0x96   :  { %3386 = vmatprep.subr.bf16.mxu1 %v3385_v59  ;;  %v264_v59 = vld [vmem:[#allocation5 + $0x648] sm:$0xff]  ;;  %v3437_v61 = vpack.c.bf16 %v312_v55, %v311_v54  ;;  %v338_v54 = vld [vmem:[#allocation5 + $0x898] sm:$0xff] }
  0x97   :  { %3356 = vmatpush3.bf16.msra.mxu0 %v3355_v1  ;;  %v314_v1 = vld [vmem:[#allocation5 + $0x7d8] sm:$0xff] }
  0x98   :  { %3390 = vmatprep.subr.bf16.mxu0 %v3389_v3  ;;  %v3439_v3 = vpack.c.bf16 %v296_v62, %v295_v60  ;;  %v3441_v8 = vpack.c.bf16 %v314_v1, %v313_v41  ;;  %v3457_v60 = vpack.c.bf16 %v338_v54, %v337_v53  ;;  %v322_v62 = vld [vmem:[#allocation5 + $0x818] sm:$0xff]  ;;  %v339_v1 = vld [vmem:[#allocation5 + $0x8a0] sm:$0xff] }
  0x99   :  { %3388 = vmatpush3.bf16.msra.mxu1 %v3387_v2  ;;  %v3407_v2 = vpack.c.bf16 %v264_v59, %v263_v32  ;;  %v3455_v32 = vpack.c.bf16 %v320_v48, %v319_v47  ;;  %v354_v41 = vld [vmem:[#allocation5 + $0x918] sm:$0xff]  ;;  %v3473_v47 = vpack.c.bf16 %v346_v42, %v345_v40  ;;  %v329_v48 = vld [vmem:[#allocation5 + $0x850] sm:$0xff]  ;;  %v347_v54 = vld [vmem:[#allocation5 + $0x8e0] sm:$0xff] }
  0x9a   :  { %3422 = vmatprep.subr.bf16.mxu1 %v3421_v7  ;;  %1318 = vmatmul.mubr.f32.vlgmr.msra.gmra.mrb[4].mxu0 %v4058_v43  ;;  %v277_v43 = vld [vmem:[#allocation5 + $0x6b0] sm:$0xff]  ;;  %v362_v53 = vld [vmem:[#allocation5 + $0x958] sm:$0xff] }
  0x9b   :  { %3392 = vmatpush3.bf16.msra.mxu0 %v3391_v16  ;;  %1457 = vmatprep.mubr.f32.mxu0 %v819_v26  ;;  %v3401_v45 = vpack.c.bf16 %v278_v39, %v277_v43  ;;  %v297_v7 = vld [vmem:[#allocation5 + $0x750] sm:$0xff]  ;;  %v316_v16 = vld [vmem:[#allocation5 + $0x7e8] sm:$0xff]  ;;  %v286_v26 = vld [vmem:[#allocation5 + $0x6f8] sm:$0xff] }
  0x9c   :  { %1388 = vmatmul.mubr.f32.vlgmr.msra.gmra.mrb[4].mxu1 %v4064_v52  ;;  %3394 = vmatprep.subr.bf16.mxu0 %v3393_v18  ;;  %v3431_v52 = vpack.c.bf16 %v292_v38, %v291_v36  ;;  %v3443_v18 = vpack.c.bf16 %v298_v9, %v297_v7  ;;  %v3445_v23 = vpack.c.bf16 %v316_v16, %v315_v14  ;;  %v301_v36 = vld [vmem:[#allocation5 + $0x770] sm:$0xff]  ;;  %v302_v38 = vld [vmem:[#allocation5 + $0x778] sm:$0xff]  ;;  %v335_v43 = vld [vmem:[#allocation5 + $0x880] sm:$0xff] }
  0x9d   :  { %3424 = vmatpush3.bf16.msra.mxu1 %v3423_v17  ;;  %1527 = vmatprep.mubr.f32.mxu1 %v820_v29  ;;  %v3411_v17 = vpack.c.bf16 %v266_v6, %v265_v5  ;;  %v3415_v29 = vpack.c.bf16 %v268_v21, %v267_v20  ;;  %v336_v39 = vld [vmem:[#allocation5 + $0x888] sm:$0xff]  ;;  %v355_v14 = vld [vmem:[#allocation5 + $0x920] sm:$0xff]  ;;  %v374_v20 = vld [vmem:[#allocation5 + $0x9b8] sm:$0xff]  ;;  %v3463_v21 = vpack.c.bf16 %v324_v13, %v323_v11 }
  0x9e   :  { %3426 = vmatprep.subr.bf16.mxu1 %v3425_v22  ;;  %v299_v22 = vld [vmem:[#allocation5 + $0x760] sm:$0xff]  ;;  %v3453_v46 = vpack.c.bf16 %v336_v39, %v335_v43  ;;  %v372_v5 = vld [vmem:[#allocation5 + $0x9a8] sm:$0xff]  ;;  %v333_v11 = vld [vmem:[#allocation5 + $0x870] sm:$0xff] }
  0x9f   :  { %3396 = vmatpush3.bf16.msra.mxu0 %v3395_v30  ;;  %v56_v30 = vld [vmem:[#allocation2 + $0x20] sm:$0xff]  ;;  %v334_v13 = vld [vmem:[#allocation5 + $0x878] sm:$0xff] }
  0xa0   :  { %3398 = vmatprep.subr.bf16.mxu0 %v3397_v33  ;;  %v3417_v33 = vpack.c.bf16 %v286_v26, %v285_v25  ;;  %v4082_v55 = vrot.slane %v56_v30, %v4043_v10  ;;  %v357_v25 = vld [vmem:[#allocation5 + $0x930] sm:$0xff]  ;;  %v360_v39 = vld [vmem:[#allocation5 + $0x948] sm:$0xff] }
  0xa1   :  { %3428 = vmatpush3.bf16.msra.mxu1 %v3427_v31  ;;  %v3447_v31 = vpack.c.bf16 %v300_v24, %v299_v22  ;;  %v326_v24 = vld [vmem:[#allocation5 + $0x838] sm:$0xff]  ;;  %v417_v40 = vld [vmem:[#allocation5 + $0xb10] sm:$0xff] }
  0xa2   :  { %3430 = vmatprep.subr.bf16.mxu1 %v3429_v37  ;;  %v3449_v37 = vpack.c.bf16 %v318_v28, %v317_v27  ;;  %v358_v27 = vld [vmem:[#allocation5 + $0x938] sm:$0xff]  ;;  %v343_v28 = vld [vmem:[#allocation5 + $0x8c0] sm:$0xff] }
  0xa3   :  { %3400 = vmatpush3.bf16.msra.mxu0 %v3399_v44  ;;  %v821_v44 = vcombine.high %v56_v30, %v56_v30  ;;  %v375_v30 = vld [vmem:[#allocation5 + $0x9c0] sm:$0xff] }
  0xa4   :  { %3402 = vmatprep.subr.bf16.mxu0 %v3401_v45  ;;  %v3451_v45 = vpack.c.bf16 %v302_v38, %v301_v36  ;;  %v327_v36 = vld [vmem:[#allocation5 + $0x840] sm:$0xff] }
  0xa5   :  { %3432 = vmatpush3.bf16.msra.mxu1 %v3431_v52  ;;  %v3419_v52 = vpack.c.bf16 %v270_v35, %v269_v34  ;;  %v3499_v34 = vpack.c.bf16 %v358_v27, %v357_v25  ;;  %v359_v38 = vld [vmem:[#allocation5 + $0x940] sm:$0xff]  ;;  %v384_v25 = vld [vmem:[#allocation5 + $0xa08] sm:$0xff] }
  0xa6   :  { %3434 = vmatprep.subr.bf16.mxu1 %v3433_v49  ;;  %v351_v49 = vld [vmem:[#allocation5 + $0x900] sm:$0xff] }
  0xa7   :  { %3404 = vmatpush3.bf16.msra.mxu0 %v3403_v56  ;;  %v369_v56 = vld [vmem:[#allocation5 + $0x990] sm:$0xff]  ;;  %v3487_v59 = vpack.c.bf16 %v352_v51, %v351_v49  ;;  %v330_v49 = vld [vmem:[#allocation5 + $0x858] sm:$0xff] }
  0xa8   :  { %3406 = vmatprep.subr.bf16.mxu0 %v3405_v58  ;;  %v4085_v58 = vrot.slane %v821_v44, %v4043_v10  ;;  %v377_v44 = vld [vmem:[#allocation5 + $0x9d0] sm:$0xff] }
  0xa9   :  { %3436 = vmatpush3.bf16.msra.mxu1 %v3435_v57  ;;  %v370_v57 = vld [vmem:[#allocation5 + $0x998] sm:$0xff] }
  0xaa   :  { %3438 = vmatprep.subr.bf16.mxu1 %v3437_v61  ;;  %v321_v61 = vld [vmem:[#allocation5 + $0x810] sm:$0xff]  ;;  %v3489_v0 = vpack.c.bf16 %v370_v57, %v369_v56  ;;  %v837_v6 = vcombine.high %v4085_v58, %v4085_v58  ;;  %v348_v56 = vld [vmem:[#allocation5 + $0x8e8] sm:$0xff]  ;;  %v379_v57 = vld [vmem:[#allocation5 + $0x9e0] sm:$0xff] }
  0xab   :  { %3408 = vmatpush3.bf16.msra.mxu0 %v3407_v2  ;;  %v340_v2 = vld [vmem:[#allocation5 + $0x8a8] sm:$0xff]  ;;  %v3459_v7 = vpack.c.bf16 %v322_v62, %v321_v61  ;;  %v3477_v61 = vpack.c.bf16 %v348_v56, %v347_v54  ;;  %v331_v62 = vld [vmem:[#allocation5 + $0x860] sm:$0xff] }
  0xac   :  { %3410 = vmatprep.subr.bf16.mxu0 %v3409_v4  ;;  %v371_v4 = vld [vmem:[#allocation5 + $0x9a0] sm:$0xff]  ;;  %v3461_v9 = vpack.c.bf16 %v340_v2, %v339_v1  ;;  %v364_v1 = vld [vmem:[#allocation5 + $0x968] sm:$0xff]  ;;  %v349_v2 = vld [vmem:[#allocation5 + $0x8f0] sm:$0xff] }
  0xad   :  { %3440 = vmatpush3.bf16.msra.mxu1 %v3439_v3  ;;  %v836_v3 = vcombine.high %v4082_v55, %v4082_v55  ;;  %v3493_v16 = vpack.c.bf16 %v372_v5, %v371_v4  ;;  %v381_v4 = vld [vmem:[#allocation5 + $0x9f0] sm:$0xff]  ;;  %v382_v5 = vld [vmem:[#allocation5 + $0x9f8] sm:$0xff]  ;;  %v387_v54 = vld [vmem:[#allocation5 + $0xa20] sm:$0xff] }
  0xae   :  { %3442 = vmatprep.subr.bf16.mxu1 %v3441_v8  ;;  %v3491_v8 = vpack.c.bf16 %v354_v41, %v353_v63  ;;  %v332_v63 = vld [vmem:[#allocation5 + $0x868] sm:$0xff] }
  0xaf   :  { %3412 = vmatpush3.bf16.msra.mxu0 %v3411_v17  ;;  %v356_v17 = vld [vmem:[#allocation5 + $0x928] sm:$0xff] }
  0xb0   :  { %3414 = vmatprep.subr.bf16.mxu0 %v3413_v19  ;;  %v373_v19 = vld [vmem:[#allocation5 + $0x9b0] sm:$0xff]  ;;  %v388_v56 = vld [vmem:[#allocation5 + $0xa28] sm:$0xff] }
  0xb1   :  { %3444 = vmatpush3.bf16.msra.mxu1 %v3443_v18  ;;  %v342_v18 = vld [vmem:[#allocation5 + $0x8b8] sm:$0xff]  ;;  %v3497_v26 = vpack.c.bf16 %v374_v20, %v373_v19  ;;  %v431_v19 = vld [vmem:[#allocation5 + $0xb80] sm:$0xff]  ;;  %v432_v20 = vld [vmem:[#allocation5 + $0xb88] sm:$0xff] }
  0xb2   :  { %3446 = vmatprep.subr.bf16.mxu1 %v3445_v23  ;;  %v325_v23 = vld [vmem:[#allocation5 + $0x830] sm:$0xff]  ;;  %v3549_v27 = vpack.c.bf16 %v432_v20, %v431_v19  ;;  %v410_v20 = vld [vmem:[#allocation5 + $0xad8] sm:$0xff] }
  0xb3   :  { %3416 = vmatpush3.bf16.msra.mxu0 %v3415_v29  ;;  %v344_v29 = vld [vmem:[#allocation5 + $0x8c8] sm:$0xff]  ;;  %v409_v19 = vld [vmem:[#allocation5 + $0xad0] sm:$0xff] }
  0xb4   :  { %3418 = vmatprep.subr.bf16.mxu0 %v3417_v33  ;;  %v3467_v33 = vpack.c.bf16 %v326_v24, %v325_v23  ;;  %v3469_v35 = vpack.c.bf16 %v344_v29, %v343_v28  ;;  %v383_v24 = vld [vmem:[#allocation5 + $0xa00] sm:$0xff]  ;;  %v416_v28 = vld [vmem:[#allocation5 + $0xb08] sm:$0xff]  ;;  %v401_v29 = vld [vmem:[#allocation5 + $0xa90] sm:$0xff] }
  0xb5   :  { %3448 = vmatpush3.bf16.msra.mxu1 %v3447_v31  ;;  %v376_v31 = vld [vmem:[#allocation5 + $0x9c8] sm:$0xff] }
  0xb6   :  { %3450 = vmatprep.subr.bf16.mxu1 %v3449_v37  ;;  %v328_v37 = vld [vmem:[#allocation5 + $0x848] sm:$0xff]  ;;  %v3501_v43 = vpack.c.bf16 %v376_v31, %v375_v30  ;;  %v402_v30 = vld [vmem:[#allocation5 + $0xa98] sm:$0xff] }
  0xb7   :  { %3420 = vmatpush3.bf16.msra.mxu0 %v3419_v52  ;;  %v378_v52 = vld [vmem:[#allocation5 + $0x9d8] sm:$0xff] }
  0xb8   :  { %3454 = vmatprep.subr.bf16.mxu0 %v3453_v46  ;;  %v3503_v46 = vpack.c.bf16 %v360_v39, %v359_v38  ;;  %v3505_v51 = vpack.c.bf16 %v378_v52, %v377_v44  ;;  %v3521_v38 = vpack.c.bf16 %v402_v30, %v401_v29  ;;  %v386_v39 = vld [vmem:[#allocation5 + $0xa18] sm:$0xff]  ;;  %v403_v52 = vld [vmem:[#allocation5 + $0xaa0] sm:$0xff] }
  0xb9   :  { %3452 = vmatpush3.bf16.msra.mxu1 %v3451_v45  ;;  %v3471_v45 = vpack.c.bf16 %v328_v37, %v327_v36  ;;  %v3519_v36 = vpack.c.bf16 %v384_v25, %v383_v24  ;;  %v418_v44 = vld [vmem:[#allocation5 + $0xb18] sm:$0xff]  ;;  %v3537_v24 = vpack.c.bf16 %v410_v20, %v409_v19  ;;  %v393_v25 = vld [vmem:[#allocation5 + $0xa50] sm:$0xff]  ;;  %v411_v30 = vld [vmem:[#allocation5 + $0xae0] sm:$0xff] }
  0xba   :  { %3486 = vmatprep.subr.bf16.mxu1 %v3485_v50  ;;  %1458 = vmatmul.mubr.f32.vlgmr.msra.gmra.mrb[6].mxu0 %v4070_v12  ;;  %v341_v12 = vld [vmem:[#allocation5 + $0x8b0] sm:$0xff]  ;;  %v426_v29 = vld [vmem:[#allocation5 + $0xb58] sm:$0xff] }
  0xbb   :  { %3456 = vmatpush3.bf16.msra.mxu0 %v3455_v32  ;;  %1597 = vmatprep.mubr.f32.mxu0 %v836_v3  ;;  %v3465_v22 = vpack.c.bf16 %v342_v18, %v341_v12  ;;  %v361_v50 = vld [vmem:[#allocation5 + $0x950] sm:$0xff]  ;;  %v380_v32 = vld [vmem:[#allocation5 + $0x9e8] sm:$0xff]  ;;  %v350_v3 = vld [vmem:[#allocation5 + $0x8f8] sm:$0xff] }
  0xbc   :  { %1528 = vmatmul.mubr.f32.vlgmr.msra.gmra.mrb[6].mxu1 %v4073_v15  ;;  %3458 = vmatprep.subr.bf16.mxu0 %v3457_v60  ;;  %v3495_v15 = vpack.c.bf16 %v356_v17, %v355_v14  ;;  %v3507_v60 = vpack.c.bf16 %v362_v53, %v361_v50  ;;  %v3509_v41 = vpack.c.bf16 %v380_v32, %v379_v57  ;;  %v365_v14 = vld [vmem:[#allocation5 + $0x970] sm:$0xff]  ;;  %v366_v17 = vld [vmem:[#allocation5 + $0x978] sm:$0xff]  ;;  %v399_v12 = vld [vmem:[#allocation5 + $0xa80] sm:$0xff] }
  0xbd   :  { %3488 = vmatpush3.bf16.msra.mxu1 %v3487_v59  ;;  %1667 = vmatprep.mubr.f32.mxu1 %v837_v6  ;;  %v3475_v59 = vpack.c.bf16 %v330_v49, %v329_v48  ;;  %v3479_v6 = vpack.c.bf16 %v332_v63, %v331_v62  ;;  %v400_v18 = vld [vmem:[#allocation5 + $0xa88] sm:$0xff]  ;;  %v419_v57 = vld [vmem:[#allocation5 + $0xb20] sm:$0xff]  ;;  %v438_v62 = vld [vmem:[#allocation5 + $0xbb8] sm:$0xff]  ;;  %v3527_v63 = vpack.c.bf16 %v388_v56, %v387_v54 }
  0xbe   :  { %3490 = vmatprep.subr.bf16.mxu1 %v3489_v0  ;;  %v363_v0 = vld [vmem:[#allocation5 + $0x960] sm:$0xff]  ;;  %v3517_v23 = vpack.c.bf16 %v400_v18, %v399_v12  ;;  %v436_v48 = vld [vmem:[#allocation5 + $0xba8] sm:$0xff]  ;;  %v397_v54 = vld [vmem:[#allocation5 + $0xa70] sm:$0xff] }
  0xbf   :  { %3460 = vmatpush3.bf16.msra.mxu0 %v3459_v7  ;;  %v57_v7 = vld [vmem:[#allocation2 + $0x28] sm:$0xff]  ;;  %v424_v18 = vld [vmem:[#allocation5 + $0xb48] sm:$0xff] }
  0xc0   :  { %3462 = vmatprep.subr.bf16.mxu0 %v3461_v9  ;;  %v3481_v9 = vpack.c.bf16 %v350_v3, %v349_v2  ;;  %v4094_v31 = vrot.slane %v57_v7, %v4043_v10  ;;  %v421_v2 = vld [vmem:[#allocation5 + $0xb30] sm:$0xff]  ;;  %v398_v56 = vld [vmem:[#allocation5 + $0xa78] sm:$0xff] }
  0xc1   :  { %3492 = vmatpush3.bf16.msra.mxu1 %v3491_v8  ;;  %v3511_v8 = vpack.c.bf16 %v364_v1, %v363_v0  ;;  %v390_v1 = vld [vmem:[#allocation5 + $0xa38] sm:$0xff]  ;;  %v481_v19 = vld [vmem:[#allocation5 + $0xd10] sm:$0xff] }
  0xc2   :  { %3494 = vmatprep.subr.bf16.mxu1 %v3493_v16  ;;  %v3513_v16 = vpack.c.bf16 %v382_v5, %v381_v4  ;;  %v422_v4 = vld [vmem:[#allocation5 + $0xb38] sm:$0xff]  ;;  %v407_v5 = vld [vmem:[#allocation5 + $0xac0] sm:$0xff] }
  0xc3   :  { %3464 = vmatpush3.bf16.msra.mxu0 %v3463_v21  ;;  %v838_v21 = vcombine.high %v57_v7, %v57_v7  ;;  %v439_v7 = vld [vmem:[#allocation5 + $0xbc0] sm:$0xff] }
  0xc4   :  { %3466 = vmatprep.subr.bf16.mxu0 %v3465_v22  ;;  %v3515_v22 = vpack.c.bf16 %v366_v17, %v365_v14  ;;  %v391_v14 = vld [vmem:[#allocation5 + $0xa40] sm:$0xff] }
  0xc5   :  { %3496 = vmatpush3.bf16.msra.mxu1 %v3495_v15  ;;  %v3483_v15 = vpack.c.bf16 %v334_v13, %v333_v11  ;;  %v3563_v11 = vpack.c.bf16 %v422_v4, %v421_v2  ;;  %v423_v17 = vld [vmem:[#allocation5 + $0xb40] sm:$0xff]  ;;  %v448_v2 = vld [vmem:[#allocation5 + $0xc08] sm:$0xff] }
  0xc6   :  { %3498 = vmatprep.subr.bf16.mxu1 %v3497_v26  ;;  %v415_v26 = vld [vmem:[#allocation5 + $0xb00] sm:$0xff] }
  0xc7   :  { %3468 = vmatpush3.bf16.msra.mxu0 %v3467_v33  ;;  %v433_v33 = vld [vmem:[#allocation5 + $0xb90] sm:$0xff]  ;;  %v3551_v37 = vpack.c.bf16 %v416_v28, %v415_v26  ;;  %v394_v26 = vld [vmem:[#allocation5 + $0xa58] sm:$0xff] }
  0xc8   :  { %3470 = vmatprep.subr.bf16.mxu0 %v3469_v35  ;;  %v4097_v35 = vrot.slane %v838_v21, %v4043_v10  ;;  %v441_v21 = vld [vmem:[#allocation5 + $0xbd0] sm:$0xff] }
  0xc9   :  { %3500 = vmatpush3.bf16.msra.mxu1 %v3499_v34  ;;  %v434_v34 = vld [vmem:[#allocation5 + $0xb98] sm:$0xff] }
  0xca   :  { %3502 = vmatprep.subr.bf16.mxu1 %v3501_v43  ;;  %v385_v43 = vld [vmem:[#allocation5 + $0xa10] sm:$0xff]  ;;  %v3553_v42 = vpack.c.bf16 %v434_v34, %v433_v33  ;;  %v854_v49 = vcombine.high %v4097_v35, %v4097_v35  ;;  %v412_v33 = vld [vmem:[#allocation5 + $0xae8] sm:$0xff]  ;;  %v443_v34 = vld [vmem:[#allocation5 + $0xbe0] sm:$0xff] }
  0xcb   :  { %3472 = vmatpush3.bf16.msra.mxu0 %v3471_v45  ;;  %v404_v45 = vld [vmem:[#allocation5 + $0xaa8] sm:$0xff]  ;;  %v3523_v50 = vpack.c.bf16 %v386_v39, %v385_v43  ;;  %v3541_v43 = vpack.c.bf16 %v412_v33, %v411_v30  ;;  %v395_v39 = vld [vmem:[#allocation5 + $0xa60] sm:$0xff] }
  0xcc   :  { %3474 = vmatprep.subr.bf16.mxu0 %v3473_v47  ;;  %v435_v47 = vld [vmem:[#allocation5 + $0xba0] sm:$0xff]  ;;  %v3525_v53 = vpack.c.bf16 %v404_v45, %v403_v52  ;;  %v428_v52 = vld [vmem:[#allocation5 + $0xb68] sm:$0xff]  ;;  %v413_v45 = vld [vmem:[#allocation5 + $0xaf0] sm:$0xff] }
  0xcd   :  { %3504 = vmatpush3.bf16.msra.mxu1 %v3503_v46  ;;  %v853_v46 = vcombine.high %v4094_v31, %v4094_v31  ;;  %v3557_v32 = vpack.c.bf16 %v436_v48, %v435_v47  ;;  %v445_v47 = vld [vmem:[#allocation5 + $0xbf0] sm:$0xff]  ;;  %v446_v48 = vld [vmem:[#allocation5 + $0xbf8] sm:$0xff]  ;;  %v451_v30 = vld [vmem:[#allocation5 + $0xc20] sm:$0xff] }
  0xce   :  { %3506 = vmatprep.subr.bf16.mxu1 %v3505_v51  ;;  %v3555_v51 = vpack.c.bf16 %v418_v44, %v417_v40  ;;  %v396_v40 = vld [vmem:[#allocation5 + $0xa68] sm:$0xff] }
  0xcf   :  { %3476 = vmatpush3.bf16.msra.mxu0 %v3475_v59  ;;  %v420_v59 = vld [vmem:[#allocation5 + $0xb28] sm:$0xff] }
  0xd0   :  { %3478 = vmatprep.subr.bf16.mxu0 %v3477_v61  ;;  %v437_v61 = vld [vmem:[#allocation5 + $0xbb0] sm:$0xff]  ;;  %v452_v33 = vld [vmem:[#allocation5 + $0xc28] sm:$0xff] }
  0xd1   :  { %3508 = vmatpush3.bf16.msra.mxu1 %v3507_v60  ;;  %v406_v60 = vld [vmem:[#allocation5 + $0xab8] sm:$0xff]  ;;  %v3561_v3 = vpack.c.bf16 %v438_v62, %v437_v61  ;;  %v495_v61 = vld [vmem:[#allocation5 + $0xd80] sm:$0xff]  ;;  %v496_v62 = vld [vmem:[#allocation5 + $0xd88] sm:$0xff] }
  0xd2   :  { %3510 = vmatprep.subr.bf16.mxu1 %v3509_v41  ;;  %v389_v41 = vld [vmem:[#allocation5 + $0xa30] sm:$0xff]  ;;  %v3613_v4 = vpack.c.bf16 %v496_v62, %v495_v61  ;;  %v474_v62 = vld [vmem:[#allocation5 + $0xcd8] sm:$0xff] }
  0xd3   :  { %3480 = vmatpush3.bf16.msra.mxu0 %v3479_v6  ;;  %v408_v6 = vld [vmem:[#allocation5 + $0xac8] sm:$0xff]  ;;  %v473_v61 = vld [vmem:[#allocation5 + $0xcd0] sm:$0xff] }
  0xd4   :  { %3482 = vmatprep.subr.bf16.mxu0 %v3481_v9  ;;  %v3531_v9 = vpack.c.bf16 %v390_v1, %v389_v41  ;;  %v3533_v13 = vpack.c.bf16 %v408_v6, %v407_v5  ;;  %v447_v1 = vld [vmem:[#allocation5 + $0xc00] sm:$0xff]  ;;  %v480_v5 = vld [vmem:[#allocation5 + $0xd08] sm:$0xff]  ;;  %v465_v6 = vld [vmem:[#allocation5 + $0xc90] sm:$0xff] }
  0xd5   :  { %3512 = vmatpush3.bf16.msra.mxu1 %v3511_v8  ;;  %v440_v8 = vld [vmem:[#allocation5 + $0xbc8] sm:$0xff] }
  0xd6   :  { %3514 = vmatprep.subr.bf16.mxu1 %v3513_v16  ;;  %v392_v16 = vld [vmem:[#allocation5 + $0xa48] sm:$0xff]  ;;  %v3565_v12 = vpack.c.bf16 %v440_v8, %v439_v7  ;;  %v466_v7 = vld [vmem:[#allocation5 + $0xc98] sm:$0xff] }
  0xd7   :  { %3484 = vmatpush3.bf16.msra.mxu0 %v3483_v15  ;;  %v442_v15 = vld [vmem:[#allocation5 + $0xbd8] sm:$0xff] }
  0xd8   :  { %3518 = vmatprep.subr.bf16.mxu0 %v3517_v23  ;;  %v3567_v23 = vpack.c.bf16 %v424_v18, %v423_v17  ;;  %v3569_v28 = vpack.c.bf16 %v442_v15, %v441_v21  ;;  %v3585_v17 = vpack.c.bf16 %v466_v7, %v465_v6  ;;  %v450_v18 = vld [vmem:[#allocation5 + $0xc18] sm:$0xff]  ;;  %v467_v15 = vld [vmem:[#allocation5 + $0xca0] sm:$0xff] }
  0xd9   :  { %3516 = vmatpush3.bf16.msra.mxu1 %v3515_v22  ;;  %v3535_v22 = vpack.c.bf16 %v392_v16, %v391_v14  ;;  %v3583_v14 = vpack.c.bf16 %v448_v2, %v447_v1  ;;  %v482_v21 = vld [vmem:[#allocation5 + $0xd18] sm:$0xff]  ;;  %v3601_v1 = vpack.c.bf16 %v474_v62, %v473_v61  ;;  %v457_v2 = vld [vmem:[#allocation5 + $0xc50] sm:$0xff]  ;;  %v475_v7 = vld [vmem:[#allocation5 + $0xce0] sm:$0xff] }
  0xda   :  { %3550 = vmatprep.subr.bf16.mxu1 %v3549_v27  ;;  %1598 = vmatmul.mubr.f32.vlgmr.msra.gmra.mrb[8].mxu0 %v4082_v55  ;;  %v405_v55 = vld [vmem:[#allocation5 + $0xab0] sm:$0xff]  ;;  %v490_v6 = vld [vmem:[#allocation5 + $0xd58] sm:$0xff] }
  0xdb   :  { %3520 = vmatpush3.bf16.msra.mxu0 %v3519_v36  ;;  %1737 = vmatprep.mubr.f32.mxu0 %v853_v46  ;;  %v3529_v0 = vpack.c.bf16 %v406_v60, %v405_v55  ;;  %v425_v27 = vld [vmem:[#allocation5 + $0xb50] sm:$0xff]  ;;  %v444_v36 = vld [vmem:[#allocation5 + $0xbe8] sm:$0xff]  ;;  %v414_v46 = vld [vmem:[#allocation5 + $0xaf8] sm:$0xff] }
  0xdc   :  { %1668 = vmatmul.mubr.f32.vlgmr.msra.gmra.mrb[8].mxu1 %v4085_v58  ;;  %3522 = vmatprep.subr.bf16.mxu0 %v3521_v38  ;;  %v3559_v58 = vpack.c.bf16 %v420_v59, %v419_v57  ;;  %v3571_v38 = vpack.c.bf16 %v426_v29, %v425_v27  ;;  %v3573_v44 = vpack.c.bf16 %v444_v36, %v443_v34  ;;  %v429_v57 = vld [vmem:[#allocation5 + $0xb70] sm:$0xff]  ;;  %v430_v59 = vld [vmem:[#allocation5 + $0xb78] sm:$0xff]  ;;  %v463_v55 = vld [vmem:[#allocation5 + $0xc80] sm:$0xff] }
  0xdd   :  { %3552 = vmatpush3.bf16.msra.mxu1 %v3551_v37  ;;  %1807 = vmatprep.mubr.f32.mxu1 %v854_v49  ;;  %v3539_v37 = vpack.c.bf16 %v394_v26, %v393_v25  ;;  %v3543_v49 = vpack.c.bf16 %v396_v40, %v395_v39  ;;  %v464_v60 = vld [vmem:[#allocation5 + $0xc88] sm:$0xff]  ;;  %v483_v34 = vld [vmem:[#allocation5 + $0xd20] sm:$0xff]  ;;  %v502_v39 = vld [vmem:[#allocation5 + $0xdb8] sm:$0xff]  ;;  %v3591_v40 = vpack.c.bf16 %v452_v33, %v451_v30 }
  0xde   :  { %3554 = vmatprep.subr.bf16.mxu1 %v3553_v42  ;;  %v427_v42 = vld [vmem:[#allocation5 + $0xb60] sm:$0xff]  ;;  %v3581_v41 = vpack.c.bf16 %v464_v60, %v463_v55  ;;  %v500_v25 = vld [vmem:[#allocation5 + $0xda8] sm:$0xff]  ;;  %v461_v30 = vld [vmem:[#allocation5 + $0xc70] sm:$0xff] }
  0xdf   :  { %3524 = vmatpush3.bf16.msra.mxu0 %v3523_v50  ;;  %v58_v50 = vld [vmem:[#allocation2 + $0x30] sm:$0xff]  ;;  %v488_v60 = vld [vmem:[#allocation5 + $0xd48] sm:$0xff]  ;;  %v545_v61 = vld [vmem:[#allocation5 + $0xf10] sm:$0xff] }
  0xe0   :  { %3526 = vmatprep.subr.bf16.mxu0 %v3525_v53  ;;  %v3545_v53 = vpack.c.bf16 %v414_v46, %v413_v45  ;;  %v4106_v8 = vrot.slane %v58_v50, %v4043_v10  ;;  %v485_v45 = vld [vmem:[#allocation5 + $0xd30] sm:$0xff]  ;;  %v462_v33 = vld [vmem:[#allocation5 + $0xc78] sm:$0xff] }
  0xe1   :  { %3556 = vmatpush3.bf16.msra.mxu1 %v3555_v51  ;;  %v3575_v51 = vpack.c.bf16 %v428_v52, %v427_v42  ;;  %v454_v52 = vld [vmem:[#allocation5 + $0xc38] sm:$0xff] }
  0xe2   :  { %3558 = vmatprep.subr.bf16.mxu1 %v3557_v32  ;;  %v3577_v32 = vpack.c.bf16 %v446_v48, %v445_v47  ;;  %v486_v47 = vld [vmem:[#allocation5 + $0xd38] sm:$0xff]  ;;  %v471_v48 = vld [vmem:[#allocation5 + $0xcc0] sm:$0xff] }
  0xe3   :  { %3528 = vmatpush3.bf16.msra.mxu0 %v3527_v63  ;;  %v855_v63 = vcombine.high %v58_v50, %v58_v50  ;;  %v503_v50 = vld [vmem:[#allocation5 + $0xdc0] sm:$0xff] }
  0xe4   :  { %3530 = vmatprep.subr.bf16.mxu0 %v3529_v0  ;;  %v3579_v0 = vpack.c.bf16 %v430_v59, %v429_v57  ;;  %v455_v57 = vld [vmem:[#allocation5 + $0xc40] sm:$0xff] }
  0xe5   :  { %3560 = vmatpush3.bf16.msra.mxu1 %v3559_v58  ;;  %v3547_v58 = vpack.c.bf16 %v398_v56, %v397_v54  ;;  %v3627_v54 = vpack.c.bf16 %v486_v47, %v485_v45  ;;  %v487_v59 = vld [vmem:[#allocation5 + $0xd40] sm:$0xff]  ;;  %v512_v45 = vld [vmem:[#allocation5 + $0xe08] sm:$0xff] }
  0xe6   :  { %3562 = vmatprep.subr.bf16.mxu1 %v3561_v3  ;;  %v479_v3 = vld [vmem:[#allocation5 + $0xd00] sm:$0xff] }
  0xe7   :  { %3532 = vmatpush3.bf16.msra.mxu0 %v3531_v9  ;;  %v497_v9 = vld [vmem:[#allocation5 + $0xd90] sm:$0xff]  ;;  %v3615_v16 = vpack.c.bf16 %v480_v5, %v479_v3  ;;  %v458_v3 = vld [vmem:[#allocation5 + $0xc58] sm:$0xff] }
  0xe8   :  { %3534 = vmatprep.subr.bf16.mxu0 %v3533_v13  ;;  %v4109_v13 = vrot.slane %v855_v63, %v4043_v10  ;;  %v505_v63 = vld [vmem:[#allocation5 + $0xdd0] sm:$0xff] }
  0xe9   :  { %3564 = vmatpush3.bf16.msra.mxu1 %v3563_v11  ;;  %v498_v11 = vld [vmem:[#allocation5 + $0xd98] sm:$0xff] }
  0xea   :  { %3566 = vmatprep.subr.bf16.mxu1 %v3565_v12  ;;  %v449_v12 = vld [vmem:[#allocation5 + $0xc10] sm:$0xff]  ;;  %v3617_v20 = vpack.c.bf16 %v498_v11, %v497_v9  ;;  %v871_v26 = vcombine.high %v4109_v13, %v4109_v13  ;;  %v476_v9 = vld [vmem:[#allocation5 + $0xce8] sm:$0xff]  ;;  %v507_v11 = vld [vmem:[#allocation5 + $0xde0] sm:$0xff] }
  0xeb   :  { %3536 = vmatpush3.bf16.msra.mxu0 %v3535_v22  ;;  %v468_v22 = vld [vmem:[#allocation5 + $0xca8] sm:$0xff]  ;;  %v3587_v27 = vpack.c.bf16 %v450_v18, %v449_v12  ;;  %v3605_v12 = vpack.c.bf16 %v476_v9, %v475_v7  ;;  %v459_v18 = vld [vmem:[#allocation5 + $0xc60] sm:$0xff] }
  0xec   :  { %3538 = vmatprep.subr.bf16.mxu0 %v3537_v24  ;;  %v499_v24 = vld [vmem:[#allocation5 + $0xda0] sm:$0xff]  ;;  %v3589_v29 = vpack.c.bf16 %v468_v22, %v467_v15  ;;  %v492_v15 = vld [vmem:[#allocation5 + $0xd68] sm:$0xff]  ;;  %v477_v22 = vld [vmem:[#allocation5 + $0xcf0] sm:$0xff] }
  0xed   :  { %3568 = vmatpush3.bf16.msra.mxu1 %v3567_v23  ;;  %v870_v23 = vcombine.high %v4106_v8, %v4106_v8  ;;  %v3621_v36 = vpack.c.bf16 %v500_v25, %v499_v24  ;;  %v509_v24 = vld [vmem:[#allocation5 + $0xdf0] sm:$0xff]  ;;  %v510_v25 = vld [vmem:[#allocation5 + $0xdf8] sm:$0xff]  ;;  %v515_v7 = vld [vmem:[#allocation5 + $0xe20] sm:$0xff] }
  0xee   :  { %3570 = vmatprep.subr.bf16.mxu1 %v3569_v28  ;;  %v3619_v28 = vpack.c.bf16 %v482_v21, %v481_v19  ;;  %v460_v19 = vld [vmem:[#allocation5 + $0xc68] sm:$0xff] }
  0xef   :  { %3540 = vmatpush3.bf16.msra.mxu0 %v3539_v37  ;;  %v484_v37 = vld [vmem:[#allocation5 + $0xd28] sm:$0xff] }
  0xf0   :  { %3542 = vmatprep.subr.bf16.mxu0 %v3541_v43  ;;  %v501_v43 = vld [vmem:[#allocation5 + $0xdb0] sm:$0xff]  ;;  %v516_v9 = vld [vmem:[#allocation5 + $0xe28] sm:$0xff] }
  0xf1   :  { %3572 = vmatpush3.bf16.msra.mxu1 %v3571_v38  ;;  %v470_v38 = vld [vmem:[#allocation5 + $0xcb8] sm:$0xff]  ;;  %v3625_v46 = vpack.c.bf16 %v502_v39, %v501_v43  ;;  %v559_v43 = vld [vmem:[#allocation5 + $0xf80] sm:$0xff]  ;;  %v560_v39 = vld [vmem:[#allocation5 + $0xf88] sm:$0xff] }
  0xf2   :  { %3574 = vmatprep.subr.bf16.mxu1 %v3573_v44  ;;  %v453_v44 = vld [vmem:[#allocation5 + $0xc30] sm:$0xff]  ;;  %v3677_v47 = vpack.c.bf16 %v560_v39, %v559_v43  ;;  %v538_v39 = vld [vmem:[#allocation5 + $0xed8] sm:$0xff] }
  0xf3   :  { %3544 = vmatpush3.bf16.msra.mxu0 %v3543_v49  ;;  %v472_v49 = vld [vmem:[#allocation5 + $0xcc8] sm:$0xff]  ;;  %v537_v43 = vld [vmem:[#allocation5 + $0xed0] sm:$0xff] }
  0xf4   :  { %3546 = vmatprep.subr.bf16.mxu0 %v3545_v53  ;;  %v3595_v53 = vpack.c.bf16 %v454_v52, %v453_v44  ;;  %v3597_v56 = vpack.c.bf16 %v472_v49, %v471_v48  ;;  %v511_v52 = vld [vmem:[#allocation5 + $0xe00] sm:$0xff]  ;;  %v544_v48 = vld [vmem:[#allocation5 + $0xf08] sm:$0xff]  ;;  %v529_v49 = vld [vmem:[#allocation5 + $0xe90] sm:$0xff] }
  0xf5   :  { %3576 = vmatpush3.bf16.msra.mxu1 %v3575_v51  ;;  %v504_v51 = vld [vmem:[#allocation5 + $0xdc8] sm:$0xff] }
  0xf6   :  { %3578 = vmatprep.subr.bf16.mxu1 %v3577_v32  ;;  %v456_v32 = vld [vmem:[#allocation5 + $0xc48] sm:$0xff]  ;;  %v3629_v55 = vpack.c.bf16 %v504_v51, %v503_v50  ;;  %v530_v50 = vld [vmem:[#allocation5 + $0xe98] sm:$0xff] }
  0xf7   :  { %3548 = vmatpush3.bf16.msra.mxu0 %v3547_v58  ;;  %v506_v58 = vld [vmem:[#allocation5 + $0xdd8] sm:$0xff] }
  0xf8   :  { %3582 = vmatprep.subr.bf16.mxu0 %v3581_v41  ;;  %v3631_v41 = vpack.c.bf16 %v488_v60, %v487_v59  ;;  %v3633_v5 = vpack.c.bf16 %v506_v58, %v505_v63  ;;  %v3649_v59 = vpack.c.bf16 %v530_v50, %v529_v49  ;;  %v514_v60 = vld [vmem:[#allocation5 + $0xe18] sm:$0xff]  ;;  %v531_v58 = vld [vmem:[#allocation5 + $0xea0] sm:$0xff] }
  0xf9   :  { %3580 = vmatpush3.bf16.msra.mxu1 %v3579_v0  ;;  %v3599_v0 = vpack.c.bf16 %v456_v32, %v455_v57  ;;  %v3647_v57 = vpack.c.bf16 %v512_v45, %v511_v52  ;;  %v546_v63 = vld [vmem:[#allocation5 + $0xf18] sm:$0xff]  ;;  %v3665_v52 = vpack.c.bf16 %v538_v39, %v537_v43  ;;  %v521_v45 = vld [vmem:[#allocation5 + $0xe50] sm:$0xff]  ;;  %v539_v50 = vld [vmem:[#allocation5 + $0xee0] sm:$0xff] }
  0xfa   :  { %3614 = vmatprep.subr.bf16.mxu1 %v3613_v4  ;;  %1738 = vmatmul.mubr.f32.vlgmr.msra.gmra.mrb[10].mxu0 %v4094_v31  ;;  %v469_v31 = vld [vmem:[#allocation5 + $0xcb0] sm:$0xff]  ;;  %v554_v49 = vld [vmem:[#allocation5 + $0xf58] sm:$0xff] }
  0xfb   :  { %3584 = vmatpush3.bf16.msra.mxu0 %v3583_v14  ;;  %1877 = vmatprep.mubr.f32.mxu0 %v870_v23  ;;  %v3593_v42 = vpack.c.bf16 %v470_v38, %v469_v31  ;;  %v489_v4 = vld [vmem:[#allocation5 + $0xd50] sm:$0xff]  ;;  %v508_v14 = vld [vmem:[#allocation5 + $0xde8] sm:$0xff]  ;;  %v478_v23 = vld [vmem:[#allocation5 + $0xcf8] sm:$0xff] }
  0xfc   :  { %1808 = vmatmul.mubr.f32.vlgmr.msra.gmra.mrb[10].mxu1 %v4097_v35  ;;  %3586 = vmatprep.subr.bf16.mxu0 %v3585_v17  ;;  %v3623_v35 = vpack.c.bf16 %v484_v37, %v483_v34  ;;  %v3635_v17 = vpack.c.bf16 %v490_v6, %v489_v4  ;;  %v3637_v21 = vpack.c.bf16 %v508_v14, %v507_v11  ;;  %v493_v34 = vld [vmem:[#allocation5 + $0xd70] sm:$0xff]  ;;  %v494_v37 = vld [vmem:[#allocation5 + $0xd78] sm:$0xff]  ;;  %v527_v31 = vld [vmem:[#allocation5 + $0xe80] sm:$0xff] }
  0xfd   :  { %3616 = vmatpush3.bf16.msra.mxu1 %v3615_v16  ;;  %1947 = vmatprep.mubr.f32.mxu1 %v871_v26  ;;  %v3603_v16 = vpack.c.bf16 %v458_v3, %v457_v2  ;;  %v3607_v26 = vpack.c.bf16 %v460_v19, %v459_v18  ;;  %v528_v38 = vld [vmem:[#allocation5 + $0xe88] sm:$0xff]  ;;  %v547_v11 = vld [vmem:[#allocation5 + $0xf20] sm:$0xff]  ;;  %v566_v18 = vld [vmem:[#allocation5 + $0xfb8] sm:$0xff]  ;;  %v3655_v19 = vpack.c.bf16 %v516_v9, %v515_v7 }
  0xfe   :  { %3618 = vmatprep.subr.bf16.mxu1 %v3617_v20  ;;  %v491_v20 = vld [vmem:[#allocation5 + $0xd60] sm:$0xff]  ;;  %v3645_v44 = vpack.c.bf16 %v528_v38, %v527_v31  ;;  %v564_v2 = vld [vmem:[#allocation5 + $0xfa8] sm:$0xff]  ;;  %v625_v39 = vld [vmem:[#allocation5 + $0x1190] sm:$0xff] }
  0xff   :  { %3588 = vmatpush3.bf16.msra.mxu0 %v3587_v27  ;;  %v59_v27 = vld [vmem:[#allocation2 + $0x38] sm:$0xff] }
 0x100   :  { %3590 = vmatprep.subr.bf16.mxu0 %v3589_v29  ;;  %v3609_v29 = vpack.c.bf16 %v478_v23, %v477_v22  ;;  %v4118_v51 = vrot.slane %v59_v27, %v4043_v10  ;;  %v549_v22 = vld [vmem:[#allocation5 + $0xf30] sm:$0xff]  ;;  %v552_v38 = vld [vmem:[#allocation5 + $0xf48] sm:$0xff] }
 0x101   :  { %3620 = vmatpush3.bf16.msra.mxu1 %v3619_v28  ;;  %v3639_v28 = vpack.c.bf16 %v492_v15, %v491_v20  ;;  %v518_v15 = vld [vmem:[#allocation5 + $0xe38] sm:$0xff] }
 0x102   :  { %3622 = vmatprep.subr.bf16.mxu1 %v3621_v36  ;;  %v3641_v36 = vpack.c.bf16 %v510_v25, %v509_v24  ;;  %v550_v24 = vld [vmem:[#allocation5 + $0xf38] sm:$0xff]  ;;  %v535_v25 = vld [vmem:[#allocation5 + $0xec0] sm:$0xff] }
 0x103   :  { %3592 = vmatpush3.bf16.msra.mxu0 %v3591_v40  ;;  %v872_v40 = vcombine.high %v59_v27, %v59_v27  ;;  %v567_v27 = vld [vmem:[#allocation5 + $0xfc0] sm:$0xff] }
 0x104   :  { %3594 = vmatprep.subr.bf16.mxu0 %v3593_v42  ;;  %v3643_v42 = vpack.c.bf16 %v494_v37, %v493_v34  ;;  %v519_v34 = vld [vmem:[#allocation5 + $0xe40] sm:$0xff] }
 0x105   :  { %3624 = vmatpush3.bf16.msra.mxu1 %v3623_v35  ;;  %v3611_v35 = vpack.c.bf16 %v462_v33, %v461_v30  ;;  %v3691_v30 = vpack.c.bf16 %v550_v24, %v549_v22  ;;  %v551_v37 = vld [vmem:[#allocation5 + $0xf40] sm:$0xff]  ;;  %v592_v22 = vld [vmem:[#allocation5 + $0x1088] sm:$0xff] }
 0x106   :  { %3626 = vmatprep.subr.bf16.mxu1 %v3625_v46  ;;  %v543_v46 = vld [vmem:[#allocation5 + $0xf00] sm:$0xff]  ;;  %v624_v24 = vld [vmem:[#allocation5 + $0x1188] sm:$0xff] }
 0x107   :  { %3596 = vmatpush3.bf16.msra.mxu0 %v3595_v53  ;;  %v561_v53 = vld [vmem:[#allocation5 + $0xf90] sm:$0xff]  ;;  %v3679_v32 = vpack.c.bf16 %v544_v48, %v543_v46  ;;  %v522_v46 = vld [vmem:[#allocation5 + $0xe58] sm:$0xff] }
 0x108   :  { %3598 = vmatprep.subr.bf16.mxu0 %v3597_v56  ;;  %v4121_v56 = vrot.slane %v872_v40, %v4043_v10  ;;  %v569_v40 = vld [vmem:[#allocation5 + $0xfd0] sm:$0xff] }
 0x109   :  { %3628 = vmatpush3.bf16.msra.mxu1 %v3627_v54  ;;  %v562_v54 = vld [vmem:[#allocation5 + $0xf98] sm:$0xff] }
 0x10a   :  { %3630 = vmatprep.subr.bf16.mxu1 %v3629_v55  ;;  %v513_v55 = vld [vmem:[#allocation5 + $0xe10] sm:$0xff]  ;;  %v3681_v62 = vpack.c.bf16 %v562_v54, %v561_v53  ;;  %v888_v3 = vcombine.high %v4121_v56, %v4121_v56  ;;  %v540_v53 = vld [vmem:[#allocation5 + $0xee8] sm:$0xff]  ;;  %v571_v54 = vld [vmem:[#allocation5 + $0xfe0] sm:$0xff] }
 0x10b   :  { %3600 = vmatpush3.bf16.msra.mxu0 %v3599_v0  ;;  %v532_v0 = vld [vmem:[#allocation5 + $0xea8] sm:$0xff]  ;;  %v3651_v4 = vpack.c.bf16 %v514_v60, %v513_v55  ;;  %v3669_v55 = vpack.c.bf16 %v540_v53, %v539_v50  ;;  %v523_v60 = vld [vmem:[#allocation5 + $0xe60] sm:$0xff] }
 0x10c   :  { %3602 = vmatprep.subr.bf16.mxu0 %v3601_v1  ;;  %v563_v1 = vld [vmem:[#allocation5 + $0xfa0] sm:$0xff]  ;;  %v3653_v6 = vpack.c.bf16 %v532_v0, %v531_v58  ;;  %v556_v0 = vld [vmem:[#allocation5 + $0xf68] sm:$0xff] }
 0x10d   :  { %3632 = vmatpush3.bf16.msra.mxu1 %v3631_v41  ;;  %v887_v41 = vcombine.high %v4118_v51, %v4118_v51  ;;  %v3685_v14 = vpack.c.bf16 %v564_v2, %v563_v1  ;;  %v542_v1 = vld [vmem:[#allocation5 + $0xef8] sm:$0xff]  ;;  %v2460_v2 = vld [vmem:[#allocation7] ss:$0 sm:$0xff]  ;;  %v596_v53 = vld [vmem:[#allocation5 + $0x10a8] sm:$0xff] }
 0x10e   :  { %3634 = vmatprep.subr.bf16.mxu1 %v3633_v5  ;;  %v3683_v5 = vpack.c.bf16 %v546_v63, %v545_v61  ;;  %v524_v61 = vld [vmem:[#allocation5 + $0xe68] sm:$0xff]  ;;  %v595_v50 = vld [vmem:[#allocation5 + $0x10a0] sm:$0xff] }
 0x10f   :  { %3604 = vmatpush3.bf16.msra.mxu0 %v3603_v16  ;;  %v548_v16 = vld [vmem:[#allocation5 + $0xf28] sm:$0xff] }
 0x110   :  { %3606 = vmatprep.subr.bf16.mxu0 %v3605_v12  ;;  %v565_v12 = vld [vmem:[#allocation5 + $0xfb0] sm:$0xff] }
 0x111   :  { %3636 = vmatpush3.bf16.msra.mxu1 %v3635_v17  ;;  %v534_v17 = vld [vmem:[#allocation5 + $0xeb8] sm:$0xff]  ;;  %v3689_v23 = vpack.c.bf16 %v566_v18, %v565_v12  ;;  %v525_v12 = vld [vmem:[#allocation5 + $0xe70] sm:$0xff] }
 0x112   :  { %3638 = vmatprep.subr.bf16.mxu1 %v3637_v21  ;;  %v517_v21 = vld [vmem:[#allocation5 + $0xe30] sm:$0xff]  ;;  %v526_v18 = vld [vmem:[#allocation5 + $0xe78] sm:$0xff] }
 0x113   :  { %3608 = vmatpush3.bf16.msra.mxu0 %v3607_v26  ;;  %v536_v26 = vld [vmem:[#allocation5 + $0xec8] sm:$0xff] }
 0x114   :  { %3610 = vmatprep.subr.bf16.mxu0 %v3609_v29  ;;  %v3659_v29 = vpack.c.bf16 %v518_v15, %v517_v21  ;;  %v3661_v33 = vpack.c.bf16 %v536_v26, %v535_v25  ;;  %v558_v21 = vld [vmem:[#allocation5 + $0xf78] sm:$0xff]  ;;  %v591_v15 = vld [vmem:[#allocation5 + $0x1080] sm:$0xff] }
 0x115   :  { %3640 = vmatpush3.bf16.msra.mxu1 %v3639_v28  ;;  %v568_v28 = vld [vmem:[#allocation5 + $0xfc8] sm:$0xff] }
 0x116   :  { %3642 = vmatprep.subr.bf16.mxu1 %v3641_v36  ;;  %v520_v36 = vld [vmem:[#allocation5 + $0xe48] sm:$0xff]  ;;  %v3693_v31 = vpack.c.bf16 %v568_v28, %v567_v27  ;;  %v3675_v27 = vpack.c.bf16 %v526_v18, %v525_v12 }
 0x117   :  { %3612 = vmatpush3.bf16.msra.mxu0 %v3611_v35  ;;  %v570_v35 = vld [vmem:[#allocation5 + $0xfd8] sm:$0xff]  ;;  %v632_v12 = vld [vmem:[#allocation5 + $0x11c8] sm:$0xff] }
 0x118   :  { %3646 = vmatprep.subr.bf16.mxu0 %v3645_v44  ;;  %v3695_v44 = vpack.c.bf16 %v552_v38, %v551_v37  ;;  %v3697_v48 = vpack.c.bf16 %v570_v35, %v569_v40  ;;  %v608_v37 = vld [vmem:[#allocation5 + $0x1108] sm:$0xff]  ;;  %v594_v38 = vld [vmem:[#allocation5 + $0x1098] sm:$0xff] }
 0x119   :  { %3644 = vmatpush3.bf16.msra.mxu1 %v3643_v42  ;;  %v3663_v42 = vpack.c.bf16 %v520_v36, %v519_v34  ;;  %v607_v34 = vld [vmem:[#allocation5 + $0x1100] sm:$0xff]  ;;  %v626_v40 = vld [vmem:[#allocation5 + $0x1198] sm:$0xff] }
 0x11a   :  { %3678 = vmatprep.subr.bf16.mxu1 %v3677_v47  ;;  %1878 = vmatmul.mubr.f32.vlgmr.msra.gmra.mrb[12].mxu0 %v4106_v8  ;;  %v533_v8 = vld [vmem:[#allocation5 + $0xeb0] sm:$0xff] }
 0x11b   :  { %3648 = vmatpush3.bf16.msra.mxu0 %v3647_v57  ;;  %2017 = vmatprep.mubr.f32.mxu0 %v887_v41  ;;  %v3657_v20 = vpack.c.bf16 %v534_v17, %v533_v8  ;;  %v553_v47 = vld [vmem:[#allocation5 + $0xf50] sm:$0xff]  ;;  %v572_v57 = vld [vmem:[#allocation5 + $0xfe8] sm:$0xff] }
 0x11c   :  { %1948 = vmatmul.mubr.f32.vlgmr.msra.gmra.mrb[12].mxu1 %v4109_v13  ;;  %3650 = vmatprep.subr.bf16.mxu0 %v3649_v59  ;;  %v3687_v13 = vpack.c.bf16 %v548_v16, %v547_v11  ;;  %v3699_v59 = vpack.c.bf16 %v554_v49, %v553_v47  ;;  %v3701_v58 = vpack.c.bf16 %v572_v57, %v571_v54  ;;  %v541_v41 = vld [vmem:[#allocation5 + $0xef0] sm:$0xff]  ;;  %v610_v49 = vld [vmem:[#allocation5 + $0x1118] sm:$0xff]  ;;  %v627_v57 = vld [vmem:[#allocation5 + $0x11a0] sm:$0xff] }
 0x11d   :  { %3680 = vmatpush3.bf16.msra.mxu1 %v3679_v32  ;;  %2087 = vmatprep.mubr.f32.mxu1 %v888_v3  ;;  %v3667_v32 = vpack.c.bf16 %v522_v46, %v521_v45  ;;  %v3671_v11 = vpack.c.bf16 %v524_v61, %v523_v60  ;;  %v3673_v17 = vpack.c.bf16 %v542_v1, %v541_v41  ;;  %v577_v45 = vld [vmem:[#allocation5 + $0x1010] sm:$0xff]  ;;  %v578_v46 = vld [vmem:[#allocation5 + $0x1018] sm:$0xff]  ;;  %v612_v41 = vld [vmem:[#allocation5 + $0x1128] sm:$0xff] }
 0x11e   :  { %3682 = vmatprep.subr.bf16.mxu1 %v3681_v62  ;;  %v555_v62 = vld [vmem:[#allocation5 + $0xf60] sm:$0xff]  ;;  %v609_v47 = vld [vmem:[#allocation5 + $0x1110] sm:$0xff]  ;;  %v3717_v61 = vpack.c.bf16 %v596_v53, %v595_v50  ;;  %v598_v1 = vld [vmem:[#allocation5 + $0x10b8] sm:$0xff] }
 0x11f   :  { %3652 = vmatpush3.bf16.msra.mxu0 %v3651_v4  ;;  %v3703_v8 = vpack.c.bf16 %v556_v0, %v555_v62  ;;  %v3747_v60 = vpack.c.bf16 %v610_v49, %v609_v47  ;;  %v579_v62 = vld [vmem:[#allocation5 + $0x1020] sm:$0xff] }
 0x120   :  { %3654 = vmatprep.subr.bf16.mxu0 %v3653_v6  ;;  %v574_v6 = vld [vmem:[#allocation5 + $0xff8] sm:$0xff]  ;;  %v587_v47 = vld [vmem:[#allocation5 + $0x1060] sm:$0xff] }
 0x121   :  { %3684 = vmatpush3.bf16.msra.mxu1 %v3683_v5  ;;  %v573_v5 = vld [vmem:[#allocation5 + $0xff0] sm:$0xff]  ;;  %v619_v49 = vld [vmem:[#allocation5 + $0x1160] sm:$0xff] }
 0x122   :  { %3686 = vmatprep.subr.bf16.mxu1 %v3685_v14  ;;  %v60_v14 = vld [vmem:[#allocation2 + $0x40] sm:$0xff] }
 0x123   :  { %3656 = vmatpush3.bf16.msra.mxu0 %v3655_v19  ;;  %v557_v19 = vld [vmem:[#allocation5 + $0xf70] sm:$0xff]  ;;  %v889_v25 = vcombine.high %v60_v14, %v60_v14  ;;  %v4132_v43 = vrot.slane %v60_v14, %v4043_v10  ;;  %v614_v14 = vld [vmem:[#allocation5 + $0x1138] sm:$0xff] }
 0x124   :  { %3658 = vmatprep.subr.bf16.mxu0 %v3657_v20  ;;  %v3705_v20 = vpack.c.bf16 %v574_v6, %v573_v5  ;;  %v3707_v28 = vpack.c.bf16 %v558_v21, %v557_v19  ;;  %v581_v6 = vld [vmem:[#allocation5 + $0x1030] sm:$0xff]  ;;  %v584_v21 = vld [vmem:[#allocation5 + $0x1048] sm:$0xff] }
 0x125   :  { %3688 = vmatpush3.bf16.msra.mxu1 %v3687_v13  ;;  %v4135_v35 = vrot.slane %v889_v25, %v4043_v10  ;;  %v904_v54 = vcombine.high %v4132_v43, %v4132_v43  ;;  %v602_v25 = vld [vmem:[#allocation5 + $0x10d8] sm:$0xff] }
 0x126   :  { %3690 = vmatprep.subr.bf16.mxu1 %v3689_v23  ;;  %v623_v23 = vld [vmem:[#allocation5 + $0x1180] sm:$0xff] }
 0x127   :  { %3660 = vmatpush3.bf16.msra.mxu0 %v3659_v29  ;;  %v3709_v29 = vpack.c.bf16 %v592_v22, %v591_v15  ;;  %v3741_v36 = vpack.c.bf16 %v624_v24, %v623_v23  ;;  %v615_v15 = vld [vmem:[#allocation5 + $0x1140] sm:$0xff]  ;;  %v616_v23 = vld [vmem:[#allocation5 + $0x1148] sm:$0xff]  ;;  %v601_v24 = vld [vmem:[#allocation5 + $0x10d0] sm:$0xff] }
 0x128   :  { %3662 = vmatprep.subr.bf16.mxu0 %v3661_v33  ;;  %v576_v33 = vld [vmem:[#allocation5 + $0x1008] sm:$0xff] }
 0x129   :  { %3692 = vmatpush3.bf16.msra.mxu1 %v3691_v30  ;;  %v575_v30 = vld [vmem:[#allocation5 + $0x1000] sm:$0xff] }
 0x12a   :  { %3694 = vmatprep.subr.bf16.mxu1 %v3693_v31  ;;  %v593_v31 = vld [vmem:[#allocation5 + $0x1090] sm:$0xff] }
 0x12b   :  { %3664 = vmatpush3.bf16.msra.mxu0 %v3663_v42  ;;  %v3711_v42 = vpack.c.bf16 %v576_v33, %v575_v30  ;;  %v3759_v30 = vpack.c.bf16 %v616_v23, %v615_v15  ;;  %v3729_v33 = vpack.c.bf16 %v602_v25, %v601_v24  ;;  %v657_v15 = vld [vmem:[#allocation5 + $0x1290] sm:$0xff]  ;;  %v690_v25 = vld [vmem:[#allocation5 + $0x1398] sm:$0xff] }
 0x12c   :  { %3666 = vmatprep.subr.bf16.mxu0 %v3665_v52  ;;  %v3713_v52 = vpack.c.bf16 %v594_v38, %v593_v31  ;;  %v618_v38 = vld [vmem:[#allocation5 + $0x1158] sm:$0xff]  ;;  %v689_v24 = vld [vmem:[#allocation5 + $0x1390] sm:$0xff] }
 0x12d   :  { %3696 = vmatpush3.bf16.msra.mxu1 %v3695_v44  ;;  %v2494_v63 = vpop.f32.mrb[0].mxu0  ;;  %v3743_v44 = vpack.c.bf16 %v608_v37, %v607_v34  ;;  %v585_v34 = vld [vmem:[#allocation5 + $0x1050] sm:$0xff] }
 0x12e   :  { %3698 = vmatprep.subr.bf16.mxu1 %v3697_v48  ;;  %v2495_v3 = vpop.f32.mrb[1].mxu0  ;;  %v3745_v48 = vpack.c.bf16 %v626_v40, %v625_v39  ;;  %v617_v37 = vld [vmem:[#allocation5 + $0x1150] sm:$0xff]  ;;  %v603_v39 = vld [vmem:[#allocation5 + $0x10e0] sm:$0xff]  ;;  %v604_v40 = vld [vmem:[#allocation5 + $0x10e8] sm:$0xff] }
 0x12f   :  { %v2529_v4 = vpop.f32.mrb[0].mxu1  ;;  %v2496_v7 = vadd.f32 %v2495_v3, %v2494_v63  ;;  %3668 = vmatpush3.bf16.msra.mxu0 %v3667_v32  ;;  %v628_v32 = vld [vmem:[#allocation5 + $0x11a8] sm:$0xff]  ;;  %v630_v3 = vld [vmem:[#allocation5 + $0x11b8] sm:$0xff] }
 0x130   :  { %v2530_v9 = vpop.f32.mrb[1].mxu1  ;;  %3670 = vmatprep.subr.bf16.mxu0 %v3669_v55  ;;  %v3715_v55 = vpack.c.bf16 %v578_v46, %v577_v45  ;;  %v580_v63 = vld [vmem:[#allocation5 + $0x1028] sm:$0xff]  ;;  %v3749_v0 = vpack.c.bf16 %v628_v32, %v627_v57  ;;  %v3763_v45 = vpack.c.bf16 %v618_v38, %v617_v37  ;;  %v3733_v46 = vpack.c.bf16 %v604_v40, %v603_v39  ;;  %v605_v57 = vld [vmem:[#allocation5 + $0x10f0] sm:$0xff]  ;;  %v606_v32 = vld [vmem:[#allocation5 + $0x10f8] sm:$0xff] }
 0x131   :  { %v2531_v16 = vadd.f32 %v2530_v9, %v2529_v4  ;;  %3700 = vmatpush3.bf16.msra.mxu1 %v3699_v59  ;;  %v1040_v13 = vadd.f32 %v2496_v7, %v2460_v2  ;;  %v905_v59 = vcombine.high %v4135_v35, %v4135_v35  ;;  %v629_v2 = vld [vmem:[#allocation5 + $0x11b0] sm:$0xff]  ;;  %v3719_v4 = vpack.c.bf16 %v580_v63, %v579_v62  ;;  %v582_v7 = vld [vmem:[#allocation5 + $0x1038] sm:$0xff]  ;;  %v659_v38 = vld [vmem:[#allocation5 + $0x12a0] sm:$0xff] }
 0x132   :  { %3702 = vmatprep.subr.bf16.mxu1 %v3701_v58  ;;  %v611_v58 = vld [vmem:[#allocation5 + $0x1120] sm:$0xff]  ;;  %v613_v9 = vld [vmem:[#allocation5 + $0x1130] sm:$0xff]  ;;  %v3723_v18 = vpack.c.bf16 %v582_v7, %v581_v6  ;;  %v622_v6 = vld [vmem:[#allocation5 + $0x1178] sm:$0xff]  ;;  %v3809_v37 = vpack.c.bf16 %v690_v25, %v689_v24 }
 0x133   :  { %v4129_v26 = vadd.f32 %v2531_v16, %v1040_v13  ;;  %3672 = vmatpush3.bf16.msra.mxu0 %v3671_v11  ;;  %v3753_v11 = vpack.c.bf16 %v630_v3, %v629_v2  ;;  %v599_v16 = vld [vmem:[#allocation5 + $0x10c0] sm:$0xff]  ;;  %v3755_v19 = vpack.c.bf16 %v614_v14, %v613_v9  ;;  %v589_v2 = vld [vmem:[#allocation5 + $0x1070] sm:$0xff]  ;;  %v590_v3 = vld [vmem:[#allocation5 + $0x1078] sm:$0xff] }
 0x134   :  { %3674 = vmatprep.subr.bf16.mxu0 %v3673_v17  ;;  %v631_v17 = vld [vmem:[#allocation5 + $0x11c0] sm:$0xff]  ;;  %v656_v9 = vld [vmem:[#allocation5 + $0x1288] sm:$0xff] }
 0x135   :  { %3704 = vmatpush3.bf16.msra.mxu1 %v3703_v8  ;;  %v600_v8 = vld [vmem:[#allocation5 + $0x10c8] sm:$0xff]  ;;  %v3757_v22 = vpack.c.bf16 %v632_v12, %v631_v17  ;;  %v655_v7 = vld [vmem:[#allocation5 + $0x1280] sm:$0xff]  ;;  %v3739_v17 = vpack.c.bf16 %v590_v3, %v589_v2 }
 0x136   :  { %3706 = vmatprep.subr.bf16.mxu1 %v3705_v20  ;;  %v3725_v13 = vpack.c.bf16 %v600_v8, %v599_v16  ;;  %v583_v20 = vld [vmem:[#allocation5 + $0x1040] sm:$0xff]  ;;  %v688_v14 = vld [vmem:[#allocation5 + $0x1388] sm:$0xff] }
 0x137   :  { %3676 = vmatpush3.bf16.msra.mxu0 %v3675_v27  ;;  %v633_v27 = vld [vmem:[#allocation5 + $0x11d0] sm:$0xff]  ;;  %v660_v39 = vld [vmem:[#allocation5 + $0x12a8] sm:$0xff]  ;;  %v699_v25 = vld [vmem:[#allocation5 + $0x13e0] sm:$0xff] }
 0x138   :  { %3710 = vmatprep.subr.bf16.mxu0 %v3709_v29  ;;  %v3727_v29 = vpack.c.bf16 %v584_v21, %v583_v20  ;;  %v671_v20 = vld [vmem:[#allocation5 + $0x1300] sm:$0xff]  ;;  %v672_v21 = vld [vmem:[#allocation5 + $0x1308] sm:$0xff] }
 0x139   :  { %3708 = vmatpush3.bf16.msra.mxu1 %v3707_v28  ;;  %v634_v28 = vld [vmem:[#allocation5 + $0x11d8] sm:$0xff]  ;;  %v668_v24 = vld [vmem:[#allocation5 + $0x12e8] sm:$0xff] }
 0x13a   :  { %3742 = vmatprep.subr.bf16.mxu1 %v3741_v36  ;;  %2018 = vmatmul.mubr.f32.vlgmr.msra.gmra.mrb[14].mxu0 %v4118_v51  ;;  %v597_v51 = vld [vmem:[#allocation5 + $0x10b0] sm:$0xff]  ;;  %v586_v36 = vld [vmem:[#allocation5 + $0x1058] sm:$0xff]  ;;  %v3761_v31 = vpack.c.bf16 %v634_v28, %v633_v27 }
 0x13b   :  { %3712 = vmatpush3.bf16.msra.mxu0 %v3711_v42  ;;  %2157 = vmatprep.mubr.f32.mxu0 %v904_v54  ;;  %v3721_v5 = vpack.c.bf16 %v598_v1, %v597_v51  ;;  %v635_v42 = vld [vmem:[#allocation5 + $0x11e0] sm:$0xff]  ;;  %v620_v54 = vld [vmem:[#allocation5 + $0x1168] sm:$0xff]  ;;  %v3737_v1 = vpack.c.bf16 %v606_v32, %v605_v57  ;;  %v693_v57 = vld [vmem:[#allocation5 + $0x13b0] sm:$0xff] }
 0x13c   :  { %2088 = vmatmul.mubr.f32.vlgmr.msra.gmra.mrb[14].mxu1 %v4121_v56  ;;  %3714 = vmatprep.subr.bf16.mxu0 %v3713_v52  ;;  %v3751_v56 = vpack.c.bf16 %v612_v41, %v611_v58  ;;  %v3731_v52 = vpack.c.bf16 %v586_v36, %v585_v34  ;;  %v3767_v51 = vpack.c.bf16 %v620_v54, %v619_v49  ;;  %v642_v34 = vld [vmem:[#allocation5 + $0x1218] sm:$0xff]  ;;  %v673_v36 = vld [vmem:[#allocation5 + $0x1310] sm:$0xff]  ;;  %v675_v49 = vld [vmem:[#allocation5 + $0x1320] sm:$0xff] }
 0x13d   :  { %3744 = vmatpush3.bf16.msra.mxu1 %v3743_v44  ;;  %2227 = vmatprep.mubr.f32.mxu1 %v905_v59  ;;  %v636_v44 = vld [vmem:[#allocation5 + $0x11e8] sm:$0xff]  ;;  %v662_v54 = vld [vmem:[#allocation5 + $0x12b8] sm:$0xff] }
 0x13e   :  { %3746 = vmatprep.subr.bf16.mxu1 %v3745_v48  ;;  %v588_v48 = vld [vmem:[#allocation5 + $0x1068] sm:$0xff]  ;;  %v3765_v53 = vpack.c.bf16 %v636_v44, %v635_v42  ;;  %v694_v32 = vld [vmem:[#allocation5 + $0x13b8] sm:$0xff] }
 0x13f   :  { %3716 = vmatpush3.bf16.msra.mxu0 %v3715_v55  ;;  %v3735_v58 = vpack.c.bf16 %v588_v48, %v587_v47  ;;  %v692_v42 = vld [vmem:[#allocation5 + $0x13a8] sm:$0xff]  ;;  %v643_v47 = vld [vmem:[#allocation5 + $0x1220] sm:$0xff] }
 0x140   :  { %3718 = vmatprep.subr.bf16.mxu0 %v3717_v61  ;;  %v638_v61 = vld [vmem:[#allocation5 + $0x11f8] sm:$0xff]  ;;  %v644_v48 = vld [vmem:[#allocation5 + $0x1228] sm:$0xff] }
 0x141   :  { %3748 = vmatpush3.bf16.msra.mxu1 %v3747_v60  ;;  %v637_v60 = vld [vmem:[#allocation5 + $0x11f0] sm:$0xff] }
 0x142   :  { %3750 = vmatprep.subr.bf16.mxu1 %v3749_v0  ;;  %v61_v0 = vld [vmem:[#allocation2 + $0x48] sm:$0xff] }
 0x143   :  { %3720 = vmatpush3.bf16.msra.mxu0 %v3719_v4  ;;  %v621_v4 = vld [vmem:[#allocation5 + $0x1170] sm:$0xff]  ;;  %v906_v16 = vcombine.high %v61_v0, %v61_v0  ;;  %v4147_v23 = vrot.slane %v61_v0, %v4043_v10  ;;  %v663_v0 = vld [vmem:[#allocation5 + $0x12c0] sm:$0xff] }
 0x144   :  { %3722 = vmatprep.subr.bf16.mxu0 %v3721_v5  ;;  %v3769_v5 = vpack.c.bf16 %v638_v61, %v637_v60  ;;  %v3771_v12 = vpack.c.bf16 %v622_v6, %v621_v4  ;;  %v645_v60 = vld [vmem:[#allocation5 + $0x1230] sm:$0xff]  ;;  %v646_v61 = vld [vmem:[#allocation5 + $0x1238] sm:$0xff]  ;;  %v679_v6 = vld [vmem:[#allocation5 + $0x1340] sm:$0xff] }
 0x145   :  { %3752 = vmatpush3.bf16.msra.mxu1 %v3751_v56  ;;  %v4150_v27 = vrot.slane %v906_v16, %v4043_v10  ;;  %v921_v40 = vcombine.high %v4147_v23, %v4147_v23  ;;  %v691_v10 = vld [vmem:[#allocation5 + $0x13a0] sm:$0xff]  ;;  %v3787_v2 = vpack.c.bf16 %v646_v61, %v645_v60  ;;  %v697_v16 = vld [vmem:[#allocation5 + $0x13d0] sm:$0xff]  ;;  %v720_v60 = vld [vmem:[#allocation5 + $0x1488] sm:$0xff] }
 0x146   :  { %3754 = vmatprep.subr.bf16.mxu1 %v3753_v11  ;;  %v687_v11 = vld [vmem:[#allocation5 + $0x1380] sm:$0xff] }
 0x147   :  { %3724 = vmatpush3.bf16.msra.mxu0 %v3723_v18  ;;  %v3773_v18 = vpack.c.bf16 %v656_v9, %v655_v7  ;;  %v922_v44 = vcombine.high %v4150_v27, %v4150_v27  ;;  %v680_v9 = vld [vmem:[#allocation5 + $0x1348] sm:$0xff] }
 0x148   :  { %3726 = vmatprep.subr.bf16.mxu0 %v3725_v13  ;;  %v640_v13 = vld [vmem:[#allocation5 + $0x1208] sm:$0xff] }
 0x149   :  { %3756 = vmatpush3.bf16.msra.mxu1 %v3755_v19  ;;  %v639_v19 = vld [vmem:[#allocation5 + $0x1200] sm:$0xff] }
 0x14a   :  { %3758 = vmatprep.subr.bf16.mxu1 %v3757_v22  ;;  %v658_v22 = vld [vmem:[#allocation5 + $0x1298] sm:$0xff]  ;;  %v3775_v28 = vpack.c.bf16 %v640_v13, %v639_v19  ;;  %v649_v13 = vld [vmem:[#allocation5 + $0x1250] sm:$0xff] }
 0x14b   :  { %3728 = vmatpush3.bf16.msra.mxu0 %v3727_v29  ;;  %v3807_v29 = vpack.c.bf16 %v672_v21, %v671_v20  ;;  %v650_v20 = vld [vmem:[#allocation5 + $0x1258] sm:$0xff] }
 0x14c   :  { %3730 = vmatprep.subr.bf16.mxu0 %v3729_v33  ;;  %v641_v33 = vld [vmem:[#allocation5 + $0x1210] sm:$0xff] }
 0x14d   :  { %3760 = vmatpush3.bf16.msra.mxu1 %v3759_v30  ;;  %v2564_v50 = vpop.f32.mrb[2].mxu0  ;;  %v3777_v30 = vpack.c.bf16 %v658_v22, %v657_v15  ;;  %v682_v15 = vld [vmem:[#allocation5 + $0x1358] sm:$0xff]  ;;  %v667_v22 = vld [vmem:[#allocation5 + $0x12e0] sm:$0xff] }
 0x14e   :  { %3762 = vmatprep.subr.bf16.mxu1 %v3761_v31  ;;  %v2565_v59 = vpop.f32.mrb[3].mxu0  ;;  %v674_v31 = vld [vmem:[#allocation5 + $0x1318] sm:$0xff] }
 0x14f   :  { %v2599_v55 = vpop.f32.mrb[2].mxu1  ;;  %v2566_v62 = vadd.f32 %v2565_v59, %v2564_v50  ;;  %3732 = vmatpush3.bf16.msra.mxu0 %v3731_v52  ;;  %v3779_v52 = vpack.c.bf16 %v642_v34, %v641_v33  ;;  %v3813_v50 = vpack.c.bf16 %v692_v42, %v691_v10  ;;  %v3783_v59 = vpack.c.bf16 %v644_v48, %v643_v47  ;;  %v651_v34 = vld [vmem:[#allocation5 + $0x1260] sm:$0xff]  ;;  %v670_v10 = vld [vmem:[#allocation5 + $0x12f8] sm:$0xff] }
 0x150   :  { %v2600_v63 = vpop.f32.mrb[3].mxu1  ;;  %3734 = vmatprep.subr.bf16.mxu0 %v3733_v46  ;;  %v3781_v46 = vpack.c.bf16 %v660_v39, %v659_v38  ;;  %v3797_v33 = vpack.c.bf16 %v668_v24, %v667_v22  ;;  %v684_v39 = vld [vmem:[#allocation5 + $0x1368] sm:$0xff]  ;;  %v729_v24 = vld [vmem:[#allocation5 + $0x14d0] sm:$0xff] }
 0x151   :  { %v2601_v41 = vadd.f32 %v2600_v63, %v2599_v55  ;;  %3764 = vmatpush3.bf16.msra.mxu1 %v3763_v45  ;;  %v1180_v56 = vadd.f32 %v2566_v62, %v4129_v26  ;;  %v3805_v26 = vpack.c.bf16 %v688_v14, %v687_v11  ;;  %v3811_v45 = vpack.c.bf16 %v674_v31, %v673_v36  ;;  %v677_v62 = vld [vmem:[#allocation5 + $0x1330] sm:$0xff]  ;;  %v666_v14 = vld [vmem:[#allocation5 + $0x12d8] sm:$0xff]  ;;  %v652_v36 = vld [vmem:[#allocation5 + $0x1268] sm:$0xff] }
 0x152   :  { %3766 = vmatprep.subr.bf16.mxu1 %v3765_v53  ;;  %v676_v53 = vld [vmem:[#allocation5 + $0x1328] sm:$0xff]  ;;  %v3817_v63 = vpack.c.bf16 %v694_v32, %v693_v57  ;;  %v665_v11 = vld [vmem:[#allocation5 + $0x12d0] sm:$0xff]  ;;  %v3799_v48 = vpack.c.bf16 %v652_v36, %v651_v34  ;;  %v731_v34 = vld [vmem:[#allocation5 + $0x14e0] sm:$0xff] }
 0x153   :  { %v4144_v8 = vadd.f32 %v2601_v41, %v1180_v56  ;;  %3736 = vmatpush3.bf16.msra.mxu0 %v3735_v58  ;;  %v678_v58 = vld [vmem:[#allocation5 + $0x1338] sm:$0xff]  ;;  %v664_v41 = vld [vmem:[#allocation5 + $0x12c8] sm:$0xff]  ;;  %v647_v56 = vld [vmem:[#allocation5 + $0x1240] sm:$0xff]  ;;  %v3793_v19 = vpack.c.bf16 %v666_v14, %v665_v11 }
 0x154   :  { %3738 = vmatprep.subr.bf16.mxu0 %v3737_v1  ;;  %v696_v1 = vld [vmem:[#allocation5 + $0x13c8] sm:$0xff]  ;;  %v3819_v3 = vpack.c.bf16 %v678_v58, %v677_v62  ;;  %v3789_v4 = vpack.c.bf16 %v664_v41, %v663_v0  ;;  %v685_v57 = vld [vmem:[#allocation5 + $0x1370] sm:$0xff]  ;;  %v703_v0 = vld [vmem:[#allocation5 + $0x1400] sm:$0xff] }
 0x155   :  { %3768 = vmatpush3.bf16.msra.mxu1 %v3767_v51  ;;  %v695_v51 = vld [vmem:[#allocation5 + $0x13c0] sm:$0xff]  ;;  %v704_v41 = vld [vmem:[#allocation5 + $0x1408] sm:$0xff] }
 0x156   :  { %3770 = vmatprep.subr.bf16.mxu1 %v3769_v5  ;;  %v648_v5 = vld [vmem:[#allocation5 + $0x1248] sm:$0xff]  ;;  %v3821_v7 = vpack.c.bf16 %v696_v1, %v695_v51  ;;  %v721_v51 = vld [vmem:[#allocation5 + $0x1490] sm:$0xff]  ;;  %v722_v1 = vld [vmem:[#allocation5 + $0x1498] sm:$0xff] }
 0x157   :  { %3740 = vmatpush3.bf16.msra.mxu0 %v3739_v17  ;;  %v698_v17 = vld [vmem:[#allocation5 + $0x13d8] sm:$0xff]  ;;  %v707_v14 = vld [vmem:[#allocation5 + $0x1420] sm:$0xff]  ;;  %v712_v22 = vld [vmem:[#allocation5 + $0x1448] sm:$0xff] }
 0x158   :  { %3774 = vmatprep.subr.bf16.mxu0 %v3773_v18  ;;  %v3823_v18 = vpack.c.bf16 %v680_v9, %v679_v6  ;;  %v3825_v21 = vpack.c.bf16 %v698_v17, %v697_v16  ;;  %v723_v6 = vld [vmem:[#allocation5 + $0x14a0] sm:$0xff]  ;;  %v708_v16 = vld [vmem:[#allocation5 + $0x1428] sm:$0xff]  ;;  %v725_v17 = vld [vmem:[#allocation5 + $0x14b0] sm:$0xff] }
 0x159   :  { %3772 = vmatpush3.bf16.msra.mxu1 %v3771_v12  ;;  %v3791_v12 = vpack.c.bf16 %v648_v5, %v647_v56  ;;  %v706_v56 = vld [vmem:[#allocation5 + $0x1418] sm:$0xff]  ;;  %v732_v36 = vld [vmem:[#allocation5 + $0x14e8] sm:$0xff] }
 0x15a   :  { %3806 = vmatprep.subr.bf16.mxu1 %v3805_v26  ;;  %2158 = vmatmul.mubr.f32.vlgmr.msra.gmra.mrb[16].mxu0 %v4132_v43  ;;  %v661_v43 = vld [vmem:[#allocation5 + $0x12b0] sm:$0xff] }
 0x15b   :  { %3776 = vmatpush3.bf16.msra.mxu0 %v3775_v28  ;;  %2297 = vmatprep.mubr.f32.mxu0 %v921_v40  ;;  %v3785_v55 = vpack.c.bf16 %v662_v54, %v661_v43  ;;  %v681_v26 = vld [vmem:[#allocation5 + $0x1350] sm:$0xff]  ;;  %v700_v28 = vld [vmem:[#allocation5 + $0x13e8] sm:$0xff]  ;;  %v654_v54 = vld [vmem:[#allocation5 + $0x1278] sm:$0xff] }
 0x15c   :  { %2228 = vmatmul.mubr.f32.vlgmr.msra.gmra.mrb[16].mxu1 %v4135_v35  ;;  %3778 = vmatprep.subr.bf16.mxu0 %v3777_v30  ;;  %v3815_v35 = vpack.c.bf16 %v676_v53, %v675_v49  ;;  %v3827_v30 = vpack.c.bf16 %v682_v15, %v681_v26  ;;  %v3829_v38 = vpack.c.bf16 %v700_v28, %v699_v25  ;;  %v669_v40 = vld [vmem:[#allocation5 + $0x12f0] sm:$0xff]  ;;  %v727_v26 = vld [vmem:[#allocation5 + $0x14c0] sm:$0xff]  ;;  %v730_v25 = vld [vmem:[#allocation5 + $0x14d8] sm:$0xff] }
 0x15d   :  { %3808 = vmatpush3.bf16.msra.mxu1 %v3807_v29  ;;  %2367 = vmatprep.mubr.f32.mxu1 %v922_v44  ;;  %v3795_v29 = vpack.c.bf16 %v650_v20, %v649_v13  ;;  %v3801_v53 = vpack.c.bf16 %v670_v10, %v669_v40  ;;  %v653_v43 = vld [vmem:[#allocation5 + $0x1270] sm:$0xff]  ;;  %v710_v20 = vld [vmem:[#allocation5 + $0x1438] sm:$0xff]  ;;  %v711_v15 = vld [vmem:[#allocation5 + $0x1440] sm:$0xff] }
 0x15e   :  { %3810 = vmatprep.subr.bf16.mxu1 %v3809_v37  ;;  %v683_v37 = vld [vmem:[#allocation5 + $0x1360] sm:$0xff]  ;;  %v3803_v62 = vpack.c.bf16 %v654_v54, %v653_v43  ;;  %v709_v13 = vld [vmem:[#allocation5 + $0x1430] sm:$0xff]  ;;  %v3855_v28 = vpack.c.bf16 %v712_v22, %v711_v15 }
 0x15f   :  { %3780 = vmatpush3.bf16.msra.mxu0 %v3779_v52  ;;  %v701_v52 = vld [vmem:[#allocation5 + $0x13f0] sm:$0xff] }
 0x160   :  { %3782 = vmatprep.subr.bf16.mxu0 %v3781_v46  ;;  %v733_v10 = vld [vmem:[#allocation5 + $0x14f0] sm:$0xff] }
 0x161   :  { %3812 = vmatpush3.bf16.msra.mxu1 %v3811_v45  ;;  %v702_v45 = vld [vmem:[#allocation5 + $0x13f8] sm:$0xff] }
 0x162   :  { %3814 = vmatprep.subr.bf16.mxu1 %v3813_v50  ;;  %v3831_v50 = vpack.c.bf16 %v684_v39, %v683_v37  ;;  %v716_v39 = vld [vmem:[#allocation5 + $0x1468] sm:$0xff] }
 0x163   :  { %3784 = vmatpush3.bf16.msra.mxu0 %v3783_v59  ;;  %v3833_v59 = vpack.c.bf16 %v702_v45, %v701_v52 }
 0x164   :  { %3786 = vmatprep.subr.bf16.mxu0 %v3785_v55  ;;  %v719_v55 = vld [vmem:[#allocation5 + $0x1480] sm:$0xff] }
 0x165   :  { %3816 = vmatpush3.bf16.msra.mxu1 %v3815_v35  ;;  %v686_v35 = vld [vmem:[#allocation5 + $0x1378] sm:$0xff]  ;;  %v3837_v58 = vpack.c.bf16 %v720_v60, %v719_v55 }
 0x166   :  { %3818 = vmatprep.subr.bf16.mxu1 %v3817_v63  ;;  %v3835_v63 = vpack.c.bf16 %v686_v35, %v685_v57 }
 0x167   :  { %3788 = vmatpush3.bf16.msra.mxu0 %v3787_v2  ;;  %v4161_v2 = vld.sshfl [vmem:[#allocation2 + $0x50] sm:$0x33 pattern:$0x76325410] }
 0x168   :  { %3790 = vmatprep.subr.bf16.mxu0 %v3789_v4  ;;  %v705_v4 = vld [vmem:[#allocation5 + $0x1410] sm:$0xff]  ;;  %v930_v5 = vcombine.high %v4161_v2, %v4161_v2 }
 0x169   :  { %3820 = vmatpush3.bf16.msra.mxu1 %v3819_v3  ;;  %v3841_v3 = vpack.c.bf16 %v722_v1, %v721_v51  ;;  %v3843_v9 = vpack.c.bf16 %v706_v56, %v705_v4 }
 0x16a   :  { %3822 = vmatprep.subr.bf16.mxu1 %v3821_v7  ;;  %v724_v7 = vld [vmem:[#allocation5 + $0x14a8] sm:$0xff] }
 0x16b   :  { %3792 = vmatpush3.bf16.msra.mxu0 %v3791_v12  ;;  %v3845_v11 = vpack.c.bf16 %v724_v7, %v723_v6  ;;  %v726_v12 = vld [vmem:[#allocation5 + $0x14b8] sm:$0xff] }
 0x16c   :  { %3794 = vmatprep.subr.bf16.mxu0 %v3793_v19  ;;  %v3849_v19 = vpack.c.bf16 %v726_v12, %v725_v17 }
 0x16d   :  { %3824 = vmatpush3.bf16.msra.mxu1 %v3823_v18  ;;  %v2634_v31 = vpop.f32.mrb[4].mxu0  ;;  %v3847_v18 = vpack.c.bf16 %v708_v16, %v707_v14 }
 0x16e   :  { %3826 = vmatprep.subr.bf16.mxu1 %v3825_v21  ;;  %v2635_v42 = vpop.f32.mrb[5].mxu0  ;;  %v728_v21 = vld [vmem:[#allocation5 + $0x14c8] sm:$0xff] }
 0x16f   :  { %v2669_v44 = vpop.f32.mrb[4].mxu1  ;;  %v2636_v46 = vadd.f32 %v2635_v42, %v2634_v31  ;;  %3796 = vmatpush3.bf16.msra.mxu0 %v3795_v29  ;;  %v3857_v29 = vpack.c.bf16 %v730_v25, %v729_v24  ;;  %v3861_v31 = vpack.c.bf16 %v732_v36, %v731_v34  ;;  %v734_v42 = vld [vmem:[#allocation5 + $0x14f8] sm:$0xff] }
 0x170   :  { %v2670_v47 = vpop.f32.mrb[5].mxu1  ;;  %3798 = vmatprep.subr.bf16.mxu0 %v3797_v33  ;;  %v714_v33 = vld [vmem:[#allocation5 + $0x1458] sm:$0xff] }
 0x171   :  { %v2671_v49 = vadd.f32 %v2670_v47, %v2669_v44  ;;  %3828 = vmatpush3.bf16.msra.mxu1 %v3827_v30  ;;  %v1320_v32 = vadd.f32 %v2636_v46, %v4144_v8  ;;  %v3839_v8 = vpack.c.bf16 %v704_v41, %v703_v0  ;;  %v713_v30 = vld [vmem:[#allocation5 + $0x1450] sm:$0xff] }
 0x172   :  { %3830 = vmatprep.subr.bf16.mxu1 %v3829_v38  ;;  %v3859_v37 = vpack.c.bf16 %v714_v33, %v713_v30  ;;  %v715_v38 = vld [vmem:[#allocation5 + $0x1460] sm:$0xff] }
 0x173   :  { %v4159_v61 = vadd.f32 %v2671_v49, %v1320_v32  ;;  %3800 = vmatpush3.bf16.msra.mxu0 %v3799_v48  ;;  %v3863_v47 = vpack.c.bf16 %v716_v39, %v715_v38  ;;  %v3865_v49 = vpack.c.bf16 %v734_v42, %v733_v10 }
 0x174   :  { %3802 = vmatprep.subr.bf16.mxu0 %v3801_v53  ;;  %v718_v53 = vld [vmem:[#allocation5 + $0x1478] sm:$0xff] }
 0x175   :  { %3832 = vmatpush3.bf16.msra.mxu1 %v3831_v50  ;;  %v717_v50 = vld [vmem:[#allocation5 + $0x1470] sm:$0xff] }
 0x176   :  { %3834 = vmatprep.subr.bf16.mxu1 %v3833_v59  ;;  %v3867_v57 = vpack.c.bf16 %v718_v53, %v717_v50 }
 0x177   :  { %3804 = vmatpush3.bf16.msra.mxu0 %v3803_v62 }
 0x178   :  { %3838 = vmatprep.subr.bf16.mxu0 %v3837_v58 }
 0x179   :  { %3836 = vmatpush3.bf16.msra.mxu1 %v3835_v63 }
 0x17a   :  { %2298 = vmatmul.mubr.f32.vlgmr.msra.gmra.mrb[18].mxu0 %v4147_v23  ;;  %v3851_v23 = vpack.c.bf16 %v710_v20, %v709_v13 }
 0x17b   :  { %3840 = vmatpush3.bf16.msra.mxu0 %v3839_v8  ;;  %2437 = vmatprep.mubr.f32.mxu0 %v930_v5 }
 0x17c   :  { %2368 = vmatmul.mubr.f32.vlgmr.msra.gmra.mrb[18].mxu1 %v4150_v27  ;;  %3842 = vmatprep.subr.bf16.mxu0 %v3841_v3  ;;  %v3853_v27 = vpack.c.bf16 %v728_v21, %v727_v26 }
 0x17f   :  { %3844 = vmatpush3.bf16.msra.mxu0 %v3843_v9 }
 0x180   :  { %3846 = vmatprep.subr.bf16.mxu0 %v3845_v11 }
 0x183   :  { %3848 = vmatpush3.bf16.msra.mxu0 %v3847_v18 }
 0x184   :  { %3850 = vmatprep.subr.bf16.mxu0 %v3849_v19 }
 0x187   :  { %3852 = vmatpush3.bf16.msra.mxu0 %v3851_v23 }
 0x188   :  { %3854 = vmatprep.subr.bf16.mxu0 %v3853_v27 }
 0x18b   :  { %3856 = vmatpush3.bf16.msra.mxu0 %v3855_v28 }
 0x18c   :  { %3858 = vmatprep.subr.bf16.mxu0 %v3857_v29 }
 0x18d   :  { %v2704_v40 = vpop.f32.mrb[6].mxu0 }
 0x18e   :  { %v2705_v44 = vpop.f32.mrb[7].mxu0 }
 0x18f   :  { %v2739_v52 = vpop.f32.mrb[6].mxu1  ;;  %v2706_v45 = vadd.f32 %v2705_v44, %v2704_v40  ;;  %3860 = vmatpush3.bf16.msra.mxu0 %v3859_v37 }
 0x190   :  { %v2740_v46 = vpop.f32.mrb[7].mxu1  ;;  %3862 = vmatprep.subr.bf16.mxu0 %v3861_v31 }
 0x191   :  { %v2741_v48 = vadd.f32 %v2740_v46, %v2739_v52  ;;  %v1460_v43 = vadd.f32 %v2706_v45, %v4159_v61 }
 0x193   :  { %v1530_v54 = vadd.f32 %v2741_v48, %v1460_v43  ;;  %3864 = vmatpush3.bf16.msra.mxu0 %v3863_v47 }
 0x194   :  { %3866 = vmatprep.subr.bf16.mxu0 %v3865_v49 }
 0x197   :  { %3868 = vmatpush3.bf16.msra.mxu0 %v3867_v57 }
 0x19a   :  { %2438 = vmatmul.mubr.f32.vlgmr.msra.gmra.mrb[20].mxu0 %v4161_v2 }
 0x1ad   :  { %v2774_v32 = vpop.f32.mrb[8].mxu0 }
 0x1ae   :  { %v2775_v59 = vpop.f32.mrb[9].mxu0 }
 0x1af   :  { %v2809_v35 = vpop.f32.mrb[8].mxu1  ;;  %v2776_v55 = vadd.f32 %v2775_v59, %v2774_v32 }
 0x1b0   :  { %v2810_v60 = vpop.f32.mrb[9].mxu1 }
 0x1b1   :  { %v2811_v62 = vadd.f32 %v2810_v60, %v2809_v35  ;;  %v1600_v63 = vadd.f32 %v2776_v55, %v1530_v54 }
 0x1b3   :  { %v1670_v58 = vadd.f32 %v2811_v62, %v1600_v63 }
 0x1cd   :  { %v2844_v0 = vpop.f32.mrb[10].mxu0 }
 0x1ce   :  { %v2845_v41 = vpop.f32.mrb[11].mxu0 }
 0x1cf   :  { %v2879_v51 = vpop.f32.mrb[10].mxu1  ;;  %v2846_v1 = vadd.f32 %v2845_v41, %v2844_v0 }
 0x1d0   :  { %v2880_v61 = vpop.f32.mrb[11].mxu1 }
 0x1d1   :  { %v2881_v8 = vadd.f32 %v2880_v61, %v2879_v51  ;;  %v1740_v3 = vadd.f32 %v2846_v1, %v1670_v58 }
 0x1d3   :  { %v1810_v4 = vadd.f32 %v2881_v8, %v1740_v3 }
 0x1ed   :  { %v2914_v56 = vpop.f32.mrb[12].mxu0 }
 0x1ee   :  { %v2915_v5 = vpop.f32.mrb[13].mxu0 }
 0x1ef   :  { %v2949_v6 = vpop.f32.mrb[12].mxu1  ;;  %v2916_v2 = vadd.f32 %v2915_v5, %v2914_v56 }
 0x1f0   :  { %v2950_v7 = vpop.f32.mrb[13].mxu1 }
 0x1f1   :  { %v2951_v9 = vadd.f32 %v2950_v7, %v2949_v6  ;;  %v1880_v11 = vadd.f32 %v2916_v2, %v1810_v4 }
 0x1f3   :  { %v1950_v14 = vadd.f32 %v2951_v9, %v1880_v11 }
 0x20d   :  { %v2984_v16 = vpop.f32.mrb[14].mxu0 }
 0x20e   :  { %v2985_v17 = vpop.f32.mrb[15].mxu0 }
 0x20f   :  { %v3019_v12 = vpop.f32.mrb[14].mxu1  ;;  %v2986_v18 = vadd.f32 %v2985_v17, %v2984_v16 }
 0x210   :  { %v3020_v19 = vpop.f32.mrb[15].mxu1 }
 0x211   :  { %v3021_v13 = vadd.f32 %v3020_v19, %v3019_v12  ;;  %v2020_v20 = vadd.f32 %v2986_v18, %v1950_v14 }
 0x213   :  { %v2090_v26 = vadd.f32 %v3021_v13, %v2020_v20 }
 0x22d   :  { %v3054_v21 = vpop.f32.mrb[16].mxu0 }
 0x22e   :  { %v3055_v23 = vpop.f32.mrb[17].mxu0 }
 0x22f   :  { %v3089_v27 = vpop.f32.mrb[16].mxu1  ;;  %v3056_v15 = vadd.f32 %v3055_v23, %v3054_v21 }
 0x230   :  { %v3090_v22 = vpop.f32.mrb[17].mxu1 }
 0x231   :  { %v3091_v24 = vadd.f32 %v3090_v22, %v3089_v27  ;;  %v2160_v25 = vadd.f32 %v3056_v15, %v2090_v26 }
 0x233   :  { %v2230_v28 = vadd.f32 %v3091_v24, %v2160_v25 }
 0x24d   :  { %v3124_v29 = vpop.f32.mrb[18].mxu0 }
 0x24e   :  { %v3125_v30 = vpop.f32.mrb[19].mxu0 }
 0x24f   :  { %v3159_v33 = vpop.f32.mrb[18].mxu1  ;;  %v3126_v34 = vadd.f32 %v3125_v30, %v3124_v29 }
 0x250   :  { %v3160_v36 = vpop.f32.mrb[19].mxu1 }
 0x251   :  { %v3161_v37 = vadd.f32 %v3160_v36, %v3159_v33  ;;  %v2300_v31 = vadd.f32 %v3126_v34, %v2230_v28 }
 0x253   :  { %v2370_v38 = vadd.f32 %v3161_v37, %v2300_v31 }
 0x26d   :  { %v3194_v39 = vpop.f32.mrb[20].mxu0 }
 0x26e   :  { %v3195_v40 = vpop.f32.mrb[21].mxu0 }
 0x26f   :  { %v3196_v10 = vadd.f32 %v3195_v40, %v3194_v39 }
 0x271   :  { %v2440_v42 = vadd.f32 %v3196_v10, %v2370_v38 }
 0x273   :  { %2443 = vst [vmem:[#allocation8] sm:$0x3] %v2440_v42 }
 0x274   :  { %3963 = shalt.err (!%p3960_p0)
}
 0x275   :  { %s3964_s26 = scalar_lea.hbm %s4184_s3, 32 }
 0x276   :  { %p3965_p1 = scmp.ne.s32.totalorder %s4184_s3, %s3964_s26  ;;  %p3968_p2 = scmp.lt.u32.totalorder %s3964_s26, %s4184_s3 }
 0x278   :  { %p3970_p3 = pnand %p3968_p2, %p3965_p1 }
 0x27a   :  { %3973 = shalt.err (!%p3970_p3)
}
 0x27b   :  { %2453 = dma.vmem_to_hbm [thread:$0]  %s2451_s22, 32, %s4184_s3, [#allocation4]  }
 0x27c   :  { %3978 = dma.done.wait [#allocation4], 32  }
 0x27d   :  { %3979 = vsyncadd [#allocation4], 4294967264 }
 0x27e   :  { %2457 = vsyncpa [#allocation3], 1 }
 0x27f   :  { %2458 = vsyncpa [#allocation6], 1 }
 0x280   :  { %2459 = vsyncpa [#allocation4], 1 }

</bundles_post_ra>
